<compile_context>
chip_gen: v7x
topology: tpu7x:2x2x1
jax: 0.10.0
libtpu: 0.0.40
codegen_flags: <defaults>
</compile_context>

<pallas_src>
import functools

import jax
import jax.numpy as jnp
from jax.experimental import pallas as pl
from jax.experimental.pallas import tpu as pltpu


# ----------------------------------------------------------------------------
# Wrapper-side weight packing (pure layout glue, runs once outside the kernel).
# ----------------------------------------------------------------------------
def _banded_3x3(w, W, C):
    """(K, K, C, C) HWIO conv weight -> (K, W*C, W*C): one W-Toeplitz matrix per kh.

    T_kh[w_in*C + ci, w_out*C + co] = w[kh, kw, ci, co] with kw = w_in - w_out + p
    (zero outside the band) -- i.e. SAME zero-padding along W is folded into the
    band structure.
    """
    K = w.shape[0]
    p = K // 2
    mats = []
    for kh in range(K):
        t = jnp.zeros((W * C, W * C), jnp.float32)
        for kw in range(K):
            shift = jnp.eye(W, k=p - kw, dtype=jnp.float32)   # w_in == w_out + kw - p
            t = t + jnp.kron(shift, w[kh, kw].astype(jnp.float32))
        mats.append(t)
    return jnp.stack(mats, axis=0)


def _block_diag_1x1(w3, W):
    """(C, C) 1x1 conv weight -> (W*C, W*C) block-diagonal matmul weight."""
    return jnp.kron(jnp.eye(W, dtype=jnp.float32), w3.astype(jnp.float32))


def _num_tensorcores():
    """Best-effort TensorCore count (1 on v5e/v6e, 2 per chip on v7x)."""
    try:
        info = pltpu.get_tpu_info()
        for name in ("num_cores", "core_count", "num_tensorcores", "tensorcores"):
            v = getattr(info, name, None)
            if isinstance(v, int) and v > 0:
                return v
    except Exception:
        pass
    try:
        v = getattr(jax.devices()[0], "num_cores", None)
        if isinstance(v, int) and v > 0:
            return v
    except Exception:
        pass
    return 1


def _default_block_batch(B):
    cores = _num_tensorcores()
    if cores <= 1:
        return B                       # single TC: one grid step, fold batch into M
    bb = max(1, B // cores)            # multi TC: give each core its own step(s)
    while B % bb:
        bb -= 1
    return bb


# ----------------------------------------------------------------------------
# Kernel
# ----------------------------------------------------------------------------
def _eres_kernel(x_ref, t1_ref, b1_ref, t2_ref, b2_ref, t3_ref, b3_ref,
                 out_ref, *, H, WC, K, bn):
    """One block of `bn` images per grid step, all activations lane-dense (*, WC).

    x_ref  : (bn, H, WC)     lane-dense input slab (also the residual source)
    t1,t2  : (K, WC, WC)     banded 3x3 conv weights (one Toeplitz matrix per kh)
    t3     : (WC, WC)        block-diagonal 1x1 conv weight
    b*     : (1, WC)         biases pre-tiled over W
    out_ref: (bn, H, WC)     lane-dense output
    """
    f32 = jnp.float32
    cdt = t1_ref.dtype                 # MXU operand dtype (bf16 by default)
    p = K // 2
    M = bn * H

    x = x_ref[...]                                         # (bn, H, WC), f32

    def conv3x3(slab, t_ref, b_ref):
        # slab: (bn, H, WC) in compute dtype.  Zero-pad H (sublane axis) and do
        # one (M, WC) @ (WC, WC) matmul per kh row-shift, accumulating in f32.
        z = jnp.zeros((bn, p, WC), slab.dtype)
        sp = jnp.concatenate([z, slab, z], axis=1)         # (bn, H + 2p, WC)
        acc = jnp.zeros((M, WC), f32)
        for kh in range(K):                                # static unroll (K=3)
            s = sp[:, kh:kh + H, :].reshape(M, WC)
            acc = acc + jnp.dot(s, t_ref[kh], preferred_element_type=f32)
        return acc + b_ref[...].astype(f32)                # (1,WC) sublane broadcast

    # conv1 (3x3 SAME) + ReLU
    h1 = jnp.maximum(conv3x3(x.astype(cdt), t1_ref, b1_ref), 0.0)      # (M, WC)
    # conv2 (3x3 SAME) + ReLU
    h2 = jnp.maximum(
        conv3x3(h1.astype(cdt).reshape(bn, H, WC), t2_ref, b2_ref), 0.0)
    # conv3 (1x1): single block-diagonal matmul
    h3 = jnp.dot(h2.astype(cdt), t3_ref[...], preferred_element_type=f32)
    h3 = h3 + b3_ref[...].astype(f32)
    # residual add + final ReLU, lane-dense store
    out = jnp.maximum(h3 + x.astype(f32).reshape(M, WC), 0.0)
    out_ref[...] = out.reshape(bn, H, WC).astype(out_ref.dtype)


# ----------------------------------------------------------------------------
# Wrapper
# ----------------------------------------------------------------------------
def eres_block(x_nhwc, params, *, block_batch=None, compute_dtype=jnp.bfloat16):
    """EResidualBlock forward. x_nhwc: (B, H, W, C) float32 -> (B, H, W, C)."""
    B, H, W, C = x_nhwc.shape
    K = params["w1"].shape[0]
    WC = W * C
    bn = _default_block_batch(B) if block_batch is None else block_batch
    assert B % bn == 0, "block_batch must divide the batch"

    # Pack weights once in the wrapper (layout glue, not kernel work).
    t1 = _banded_3x3(params["w1"], W, C).astype(compute_dtype)        # (K, WC, WC)
    t2 = _banded_3x3(params["w2"], W, C).astype(compute_dtype)        # (K, WC, WC)
    t3 = _block_diag_1x1(params["w3"][0, 0], W).astype(compute_dtype)  # (WC, WC)
    b1 = jnp.tile(params["b1"], (1, W))                                # (1, WC)
    b2 = jnp.tile(params["b2"], (1, W))
    b3 = jnp.tile(params["b3"], (1, W))

    x_slab = x_nhwc.reshape(B, H, WC)                                  # lane-dense

    kernel = functools.partial(_eres_kernel, H=H, WC=WC, K=K, bn=bn)

    out_flat = pl.pallas_call(
        kernel,
        out_shape=jax.ShapeDtypeStruct((B, H, WC), x_nhwc.dtype),
        grid_spec=pltpu.PrefetchScalarGridSpec(
            num_scalar_prefetch=0,
            grid=(B // bn,),
            in_specs=[
                pl.BlockSpec((bn, H, WC), lambda i: (i, 0, 0)),     # x (residual too)
                pl.BlockSpec((K, WC, WC), lambda i: (0, 0, 0)),     # t1
                pl.BlockSpec((1, WC), lambda i: (0, 0)),            # b1
                pl.BlockSpec((K, WC, WC), lambda i: (0, 0, 0)),     # t2
                pl.BlockSpec((1, WC), lambda i: (0, 0)),            # b2
                pl.BlockSpec((WC, WC), lambda i: (0, 0)),           # t3
                pl.BlockSpec((1, WC), lambda i: (0, 0)),            # b3
            ],
            out_specs=pl.BlockSpec((bn, H, WC), lambda i: (i, 0, 0)),
        ),
        compiler_params=pltpu.CompilerParams(
            dimension_semantics=("parallel",)),
    )(x_slab, t1, b1, t2, b2, t3, b3)
    return out_flat.reshape(B, H, W, C)


# ----------------------------------------------------------------------------
# Pure-JAX reference (matches the PyTorch EResidualBlock forward, group=1)
# ----------------------------------------------------------------------------
def _reference(x_nhwc, params):
    dn = ("NHWC", "HWIO", "NHWC")
    h = jax.lax.conv_general_dilated(x_nhwc, params["w1"], (1, 1), "SAME",
                                     dimension_numbers=dn) + params["b1"][0]
    h = jnp.maximum(h, 0.0)
    h = jax.lax.conv_general_dilated(h, params["w2"], (1, 1), "SAME",
                                     dimension_numbers=dn) + params["b2"][0]
    h = jnp.maximum(h, 0.0)
    h = jax.lax.conv_general_dilated(h, params["w3"], (1, 1), "VALID",
                                     dimension_numbers=dn) + params["b3"][0]
    return jnp.maximum(h + x_nhwc, 0.0)


if __name__ == "__main__":
    # EResidualBlock(in_channels=16, out_channels=16, group=1)
    B, C, H, W = 2, 16, 16, 16
    K = 3

    key = jax.random.PRNGKey(0)
    ks = jax.random.split(key, 8)
    scale = 0.1
    params = {
        "w1": scale * jax.random.normal(ks[0], (K, K, C, C), jnp.float32),
        "b1": scale * jax.random.normal(ks[1], (1, C), jnp.float32),
        "w2": scale * jax.random.normal(ks[2], (K, K, C, C), jnp.float32),
        "b2": scale * jax.random.normal(ks[3], (1, C), jnp.float32),
        "w3": scale * jax.random.normal(ks[4], (1, 1, C, C), jnp.float32),
        "b3": scale * jax.random.normal(ks[5], (1, C), jnp.float32),
    }

    # PyTorch input is NCHW (B, C, H, W); transpose to NHWC for the kernel.
    x_nchw = jax.random.normal(ks[6], (B, C, H, W), jnp.float32)
    x_nhwc = jnp.transpose(x_nchw, (0, 2, 3, 1))

    out = eres_block(x_nhwc, params)
    out = jax.block_until_ready(out)

    ref = _reference(x_nhwc, params)
    # bf16 MXU operands (f32 accumulation) -> relaxed tolerance vs. the f32 reference.
    assert jnp.allclose(out, ref, rtol=5e-2, atol=5e-2), \
        f"max abs err {jnp.max(jnp.abs(out - ref))}"

    print("KERNEL_OK")
</pallas_src>

<mosaic_0001>
module attributes {stable_mosaic.version = 11 : i64} {
  func.func @_eres_kernel(%arg0: i32, %arg1: memref<2x16x256xf32, #tpu.memory_space<vmem>>, %arg2: memref<3x256x256xbf16, #tpu.memory_space<vmem>>, %arg3: memref<1x256xf32, #tpu.memory_space<vmem>>, %arg4: memref<3x256x256xbf16, #tpu.memory_space<vmem>>, %arg5: memref<1x256xf32, #tpu.memory_space<vmem>>, %arg6: memref<256x256xbf16, #tpu.memory_space<vmem>>, %arg7: memref<1x256xf32, #tpu.memory_space<vmem>>, %arg8: memref<2x16x256xf32, #tpu.memory_space<vmem>>) attributes {dimension_semantics = [#tpu.dimension_semantics<parallel>], iteration_bounds = array<i64: 1>, scalar_prefetch = 0 : i64, scratch_operands = 0 : i64, tpu.core_type = #tpu.core_type<tc>, window_params = [{transform_indices = @transform_0, window_bounds = array<i64: 2, 16, 256>}, {pipeline_mode = #tpu.pipeline_mode<synchronous>, transform_indices = @transform_1, window_bounds = array<i64: 3, 256, 256>}, {pipeline_mode = #tpu.pipeline_mode<synchronous>, transform_indices = @transform_2, window_bounds = array<i64: 1, 256>}, {pipeline_mode = #tpu.pipeline_mode<synchronous>, transform_indices = @transform_3, window_bounds = array<i64: 3, 256, 256>}, {pipeline_mode = #tpu.pipeline_mode<synchronous>, transform_indices = @transform_4, window_bounds = array<i64: 1, 256>}, {pipeline_mode = #tpu.pipeline_mode<synchronous>, transform_indices = @transform_5, window_bounds = array<i64: 256, 256>}, {pipeline_mode = #tpu.pipeline_mode<synchronous>, transform_indices = @transform_6, window_bounds = array<i64: 1, 256>}, {transform_indices = @transform_7, window_bounds = array<i64: 2, 16, 256>}]} {
    %c0 = arith.constant 0 : index
    %c0_0 = arith.constant 0 : index
    %c0_1 = arith.constant 0 : index
    %0 = vector.load %arg1[%c0, %c0_0, %c0_1] : memref<2x16x256xf32, #tpu.memory_space<vmem>>, vector<2x16x256xf32>
    %1 = arith.truncf %0 : vector<2x16x256xf32> to vector<2x16x256xbf16>
    %cst = arith.constant 0.000000e+00 : bf16
    %2 = vector.broadcast %cst : bf16 to vector<2x1x256xbf16>
    %3 = tpu.concatenate %2, %1, %2 in 1 : vector<2x1x256xbf16>, vector<2x16x256xbf16>, vector<2x1x256xbf16> -> vector<2x18x256xbf16>
    %cst_2 = arith.constant 0.000000e+00 : f32
    %4 = vector.broadcast %cst_2 : f32 to vector<32x256xf32>
    %5 = vector.extract_strided_slice %3 {offsets = [0, 0, 0], sizes = [2, 16, 256], strides = [1, 1, 1]} : vector<2x18x256xbf16> to vector<2x16x256xbf16>
    %6 = vector.shape_cast %5 : vector<2x16x256xbf16> to vector<32x256xbf16>
    %c0_3 = arith.constant 0 : index
    %c0_4 = arith.constant 0 : index
    %c0_5 = arith.constant 0 : index
    %7 = vector.load %arg2[%c0_3, %c0_4, %c0_5] : memref<3x256x256xbf16, #tpu.memory_space<vmem>>, vector<1x256x256xbf16>
    %8 = vector.shape_cast %7 : vector<1x256x256xbf16> to vector<256x256xbf16>
    %cst_6 = arith.constant dense<0.000000e+00> : vector<32x256xf32>
    %9 = tpu.matmul %6, %8, %cst_6 {dimension_numbers = #tpu.dot_dimension_numbers<[1], [0], [0], [1], [0, 0, 1, 1], [], []>} : vector<32x256xbf16>, vector<256x256xbf16>, vector<32x256xf32> -> vector<32x256xf32>
    %10 = arith.addf %4, %9 : vector<32x256xf32>
    %11 = vector.extract_strided_slice %3 {offsets = [0, 1, 0], sizes = [2, 16, 256], strides = [1, 1, 1]} : vector<2x18x256xbf16> to vector<2x16x256xbf16>
    %12 = vector.shape_cast %11 : vector<2x16x256xbf16> to vector<32x256xbf16>
    %c1 = arith.constant 1 : index
    %c0_7 = arith.constant 0 : index
    %c0_8 = arith.constant 0 : index
    %13 = vector.load %arg2[%c1, %c0_7, %c0_8] : memref<3x256x256xbf16, #tpu.memory_space<vmem>>, vector<1x256x256xbf16>
    %14 = vector.shape_cast %13 : vector<1x256x256xbf16> to vector<256x256xbf16>
    %cst_9 = arith.constant dense<0.000000e+00> : vector<32x256xf32>
    %15 = tpu.matmul %12, %14, %cst_9 {dimension_numbers = #tpu.dot_dimension_numbers<[1], [0], [0], [1], [0, 0, 1, 1], [], []>} : vector<32x256xbf16>, vector<256x256xbf16>, vector<32x256xf32> -> vector<32x256xf32>
    %16 = arith.addf %10, %15 : vector<32x256xf32>
    %17 = vector.extract_strided_slice %3 {offsets = [0, 2, 0], sizes = [2, 16, 256], strides = [1, 1, 1]} : vector<2x18x256xbf16> to vector<2x16x256xbf16>
    %18 = vector.shape_cast %17 : vector<2x16x256xbf16> to vector<32x256xbf16>
    %c2 = arith.constant 2 : index
    %c0_10 = arith.constant 0 : index
    %c0_11 = arith.constant 0 : index
    %19 = vector.load %arg2[%c2, %c0_10, %c0_11] : memref<3x256x256xbf16, #tpu.memory_space<vmem>>, vector<1x256x256xbf16>
    %20 = vector.shape_cast %19 : vector<1x256x256xbf16> to vector<256x256xbf16>
    %cst_12 = arith.constant dense<0.000000e+00> : vector<32x256xf32>
    %21 = tpu.matmul %18, %20, %cst_12 {dimension_numbers = #tpu.dot_dimension_numbers<[1], [0], [0], [1], [0, 0, 1, 1], [], []>} : vector<32x256xbf16>, vector<256x256xbf16>, vector<32x256xf32> -> vector<32x256xf32>
    %22 = arith.addf %16, %21 : vector<32x256xf32>
    %c0_13 = arith.constant 0 : index
    %c0_14 = arith.constant 0 : index
    %23 = vector.load %arg3[%c0_13, %c0_14] : memref<1x256xf32, #tpu.memory_space<vmem>>, vector<1x256xf32>
    %24 = vector.broadcast %23 : vector<1x256xf32> to vector<32x256xf32>
    %25 = arith.addf %22, %24 : vector<32x256xf32>
    %cst_15 = arith.constant 0.000000e+00 : f32
    %26 = vector.broadcast %cst_15 : f32 to vector<32x256xf32>
    %27 = arith.maximumf %25, %26 : vector<32x256xf32>
    %28 = arith.truncf %27 : vector<32x256xf32> to vector<32x256xbf16>
    %29 = vector.shape_cast %28 : vector<32x256xbf16> to vector<2x16x256xbf16>
    %cst_16 = arith.constant 0.000000e+00 : bf16
    %30 = vector.broadcast %cst_16 : bf16 to vector<2x1x256xbf16>
    %31 = tpu.concatenate %30, %29, %30 in 1 : vector<2x1x256xbf16>, vector<2x16x256xbf16>, vector<2x1x256xbf16> -> vector<2x18x256xbf16>
    %cst_17 = arith.constant 0.000000e+00 : f32
    %32 = vector.broadcast %cst_17 : f32 to vector<32x256xf32>
    %33 = vector.extract_strided_slice %31 {offsets = [0, 0, 0], sizes = [2, 16, 256], strides = [1, 1, 1]} : vector<2x18x256xbf16> to vector<2x16x256xbf16>
    %34 = vector.shape_cast %33 : vector<2x16x256xbf16> to vector<32x256xbf16>
    %c0_18 = arith.constant 0 : index
    %c0_19 = arith.constant 0 : index
    %c0_20 = arith.constant 0 : index
    %35 = vector.load %arg4[%c0_18, %c0_19, %c0_20] : memref<3x256x256xbf16, #tpu.memory_space<vmem>>, vector<1x256x256xbf16>
    %36 = vector.shape_cast %35 : vector<1x256x256xbf16> to vector<256x256xbf16>
    %cst_21 = arith.constant dense<0.000000e+00> : vector<32x256xf32>
    %37 = tpu.matmul %34, %36, %cst_21 {dimension_numbers = #tpu.dot_dimension_numbers<[1], [0], [0], [1], [0, 0, 1, 1], [], []>} : vector<32x256xbf16>, vector<256x256xbf16>, vector<32x256xf32> -> vector<32x256xf32>
    %38 = arith.addf %32, %37 : vector<32x256xf32>
    %39 = vector.extract_strided_slice %31 {offsets = [0, 1, 0], sizes = [2, 16, 256], strides = [1, 1, 1]} : vector<2x18x256xbf16> to vector<2x16x256xbf16>
    %40 = vector.shape_cast %39 : vector<2x16x256xbf16> to vector<32x256xbf16>
    %c1_22 = arith.constant 1 : index
    %c0_23 = arith.constant 0 : index
    %c0_24 = arith.constant 0 : index
    %41 = vector.load %arg4[%c1_22, %c0_23, %c0_24] : memref<3x256x256xbf16, #tpu.memory_space<vmem>>, vector<1x256x256xbf16>
    %42 = vector.shape_cast %41 : vector<1x256x256xbf16> to vector<256x256xbf16>
    %cst_25 = arith.constant dense<0.000000e+00> : vector<32x256xf32>
    %43 = tpu.matmul %40, %42, %cst_25 {dimension_numbers = #tpu.dot_dimension_numbers<[1], [0], [0], [1], [0, 0, 1, 1], [], []>} : vector<32x256xbf16>, vector<256x256xbf16>, vector<32x256xf32> -> vector<32x256xf32>
    %44 = arith.addf %38, %43 : vector<32x256xf32>
    %45 = vector.extract_strided_slice %31 {offsets = [0, 2, 0], sizes = [2, 16, 256], strides = [1, 1, 1]} : vector<2x18x256xbf16> to vector<2x16x256xbf16>
    %46 = vector.shape_cast %45 : vector<2x16x256xbf16> to vector<32x256xbf16>
    %c2_26 = arith.constant 2 : index
    %c0_27 = arith.constant 0 : index
    %c0_28 = arith.constant 0 : index
    %47 = vector.load %arg4[%c2_26, %c0_27, %c0_28] : memref<3x256x256xbf16, #tpu.memory_space<vmem>>, vector<1x256x256xbf16>
    %48 = vector.shape_cast %47 : vector<1x256x256xbf16> to vector<256x256xbf16>
    %cst_29 = arith.constant dense<0.000000e+00> : vector<32x256xf32>
    %49 = tpu.matmul %46, %48, %cst_29 {dimension_numbers = #tpu.dot_dimension_numbers<[1], [0], [0], [1], [0, 0, 1, 1], [], []>} : vector<32x256xbf16>, vector<256x256xbf16>, vector<32x256xf32> -> vector<32x256xf32>
    %50 = arith.addf %44, %49 : vector<32x256xf32>
    %c0_30 = arith.constant 0 : index
    %c0_31 = arith.constant 0 : index
    %51 = vector.load %arg5[%c0_30, %c0_31] : memref<1x256xf32, #tpu.memory_space<vmem>>, vector<1x256xf32>
    %52 = vector.broadcast %51 : vector<1x256xf32> to vector<32x256xf32>
    %53 = arith.addf %50, %52 : vector<32x256xf32>
    %cst_32 = arith.constant 0.000000e+00 : f32
    %54 = vector.broadcast %cst_32 : f32 to vector<32x256xf32>
    %55 = arith.maximumf %53, %54 : vector<32x256xf32>
    %56 = arith.truncf %55 : vector<32x256xf32> to vector<32x256xbf16>
    %c0_33 = arith.constant 0 : index
    %c0_34 = arith.constant 0 : index
    %57 = vector.load %arg6[%c0_33, %c0_34] : memref<256x256xbf16, #tpu.memory_space<vmem>>, vector<256x256xbf16>
    %cst_35 = arith.constant dense<0.000000e+00> : vector<32x256xf32>
    %58 = tpu.matmul %56, %57, %cst_35 {dimension_numbers = #tpu.dot_dimension_numbers<[1], [0], [0], [1], [0, 0, 1, 1], [], []>} : vector<32x256xbf16>, vector<256x256xbf16>, vector<32x256xf32> -> vector<32x256xf32>
    %c0_36 = arith.constant 0 : index
    %c0_37 = arith.constant 0 : index
    %59 = vector.load %arg7[%c0_36, %c0_37] : memref<1x256xf32, #tpu.memory_space<vmem>>, vector<1x256xf32>
    %60 = vector.broadcast %59 : vector<1x256xf32> to vector<32x256xf32>
    %61 = arith.addf %58, %60 : vector<32x256xf32>
    %62 = vector.shape_cast %0 : vector<2x16x256xf32> to vector<32x256xf32>
    %63 = arith.addf %61, %62 : vector<32x256xf32>
    %cst_38 = arith.constant 0.000000e+00 : f32
    %64 = vector.broadcast %cst_38 : f32 to vector<32x256xf32>
    %65 = arith.maximumf %63, %64 : vector<32x256xf32>
    %66 = vector.shape_cast %65 : vector<32x256xf32> to vector<2x16x256xf32>
    %c0_39 = arith.constant 0 : index
    %c0_40 = arith.constant 0 : index
    %c0_41 = arith.constant 0 : index
    %67 = vector.load %arg8[%c0_39, %c0_40, %c0_41] : memref<2x16x256xf32, #tpu.memory_space<vmem>>, vector<2x16x256xf32>
    tpu.vector_store %arg8[%c0_39, %c0_40, %c0_41], %66 {strides = array<i32>} : memref<2x16x256xf32, #tpu.memory_space<vmem>>, vector<2x16x256xf32>,
    return
  }
  func.func @transform_0(%arg0: i32) -> (i32, i32, i32) {
    %c0_i32 = arith.constant 0 : i32
    %c0_i32_0 = arith.constant 0 : i32
    %c0_i32_1 = arith.constant 0 : i32
    return %arg0, %c0_i32, %c0_i32_0 : i32, i32, i32
  }
  func.func @transform_1(%arg0: i32) -> (i32, i32, i32) {
    %c0_i32 = arith.constant 0 : i32
    %c0_i32_0 = arith.constant 0 : i32
    %c0_i32_1 = arith.constant 0 : i32
    %c0_i32_2 = arith.constant 0 : i32
    return %c0_i32, %c0_i32_0, %c0_i32_1 : i32, i32, i32
  }
  func.func @transform_2(%arg0: i32) -> (i32, i32) {
    %c0_i32 = arith.constant 0 : i32
    %c0_i32_0 = arith.constant 0 : i32
    %c0_i32_1 = arith.constant 0 : i32
    return %c0_i32, %c0_i32_0 : i32, i32
  }
  func.func @transform_3(%arg0: i32) -> (i32, i32, i32) {
    %c0_i32 = arith.constant 0 : i32
    %c0_i32_0 = arith.constant 0 : i32
    %c0_i32_1 = arith.constant 0 : i32
    %c0_i32_2 = arith.constant 0 : i32
    return %c0_i32, %c0_i32_0, %c0_i32_1 : i32, i32, i32
  }
  func.func @transform_4(%arg0: i32) -> (i32, i32) {
    %c0_i32 = arith.constant 0 : i32
    %c0_i32_0 = arith.constant 0 : i32
    %c0_i32_1 = arith.constant 0 : i32
    return %c0_i32, %c0_i32_0 : i32, i32
  }
  func.func @transform_5(%arg0: i32) -> (i32, i32) {
    %c0_i32 = arith.constant 0 : i32
    %c0_i32_0 = arith.constant 0 : i32
    %c0_i32_1 = arith.constant 0 : i32
    return %c0_i32, %c0_i32_0 : i32, i32
  }
  func.func @transform_6(%arg0: i32) -> (i32, i32) {
    %c0_i32 = arith.constant 0 : i32
    %c0_i32_0 = arith.constant 0 : i32
    %c0_i32_1 = arith.constant 0 : i32
    return %c0_i32, %c0_i32_0 : i32, i32
  }
  func.func @transform_7(%arg0: i32) -> (i32, i32, i32) {
    %c0_i32 = arith.constant 0 : i32
    %c0_i32_0 = arith.constant 0 : i32
    %c0_i32_1 = arith.constant 0 : i32
    return %arg0, %c0_i32, %c0_i32_0 : i32, i32, i32
  }
}

</mosaic_0001>

<bundles_post_ra>
// kernel: tpu_custom_call.1
= control target key start
LH: loop header
LB: loop body
LE: loop exit
PB: predicated region body
PF: predicated region fallthrough
CT: control target
= control target key end

     0   :  { %12 = vsyncpa [#allocation3], 0  ;;  %s3343_s0 = inlined_call_operand.hbm [shape: f32[2,16,256], index: 0, kind: input, shape index: {}]   ;;  %s3344_s1 = inlined_call_operand.hbm [shape: bf16[3,256,256], index: 1, kind: input, shape index: {}]   ;;  %s3345_s2 = inlined_call_operand.vmem [shape: f32[1,256], index: 2, kind: input, shape index: {}]   ;;  %s3346_s3 = inlined_call_operand.hbm [shape: bf16[3,256,256], index: 3, kind: input, shape index: {}]   ;;  %s3347_s4 = inlined_call_operand.vmem [shape: f32[1,256], index: 4, kind: input, shape index: {}]   ;;  %s3348_s5 = inlined_call_operand.hbm [shape: bf16[256,256], index: 5, kind: input, shape index: {}]   ;;  %s3349_s6 = inlined_call_operand.vmem [shape: f32[1,256], index: 6, kind: input, shape index: {}]   ;;  %s3350_s7 = inlined_call_operand.hbm [shape: f32[2,16,256], index: 7, kind: output, shape index: {}]  }
   0x1   :  { %13 = vsyncpa [#allocation6], 0 }
   0x2   :  { %14 = vsyncpa [#allocation9], 0 }
   0x3   :  { %15 = vsyncpa [#allocation4], 0  ;;  %s2953_s24 = smov [#allocation5]   ;;  %s2835_s28 = scalar_lea.hbm %s3344_s1, 12288 }
   0x4   :  { %s33_s25 = sshll.u32 %s2953_s24, 4  ;;  %p2836_p0 = scmp.ne.s32.totalorder %s3344_s1, %s2835_s28  ;;  %s34_s25 = int_to_ptr.vmem [resolvable:$true] %s33_s25 }
   0x5   :  { %p2839_p1 = scmp.lt.u32.totalorder %s2835_s28, %s3344_s1 }
   0x7   :  { %p2841_p2 = pnand %p2839_p1, %p2836_p0 }
   0x9   :  { %2844 = shalt.err (!%p2841_p2)
}
   0xa   :  { %s2845_s10 = scalar_lea.vmem %s34_s25, 12288  ;;  %p2850_p4 = scmp.lt.s32.totalorder %s34_s25, %s34_s25 }
   0xb   :  { %p2846_p3 = scmp.ne.s32.totalorder %s34_s25, %s2845_s10  ;;  %p2851_p5 = scmp.lt.s32.totalorder %s2845_s10, %s2845_s10 }
   0xd   :  { %p2852_p6 = por %p2851_p5, %p2850_p4 }
   0xf   :  { %p2853_p7 = pnand %p2852_p6, %p2846_p3 }
  0x11   :  { %2856 = shalt.err (!%p2853_p7)
}
  0x12   :  { %s2954_s11 = smov 128   ;;  %s2955_s12 = smov 8  }
  0x13   :  { %39 = dma.hbm_to_vmem [thread:$0]  %s3344_s1, 12288, %s34_s25, [#allocation6], %s2954_s11, %s2954_s11, %s2955_s12  }
  0x14   :  { %s2956_s15 = smov [#allocation2]   ;;  %s2857_s19 = scalar_lea.hbm %s3343_s0, 1024 }
  0x15   :  { %s21_s16 = sshll.u32 %s2956_s15, 4  ;;  %p2858_p8 = scmp.ne.s32.totalorder %s3343_s0, %s2857_s19  ;;  %s22_s16 = int_to_ptr.vmem [resolvable:$true] %s21_s16 }
  0x16   :  { %p2861_p9 = scmp.lt.u32.totalorder %s2857_s19, %s3343_s0 }
  0x18   :  { %p2863_p10 = pnand %p2861_p9, %p2858_p8 }
  0x1a   :  { %2866 = shalt.err (!%p2863_p10)
}
  0x1b   :  { %s2867_s24 = scalar_lea.vmem %s22_s16, 1024  ;;  %p2872_p12 = scmp.lt.s32.totalorder %s22_s16, %s22_s16 }
  0x1c   :  { %p2868_p11 = scmp.ne.s32.totalorder %s22_s16, %s2867_s24  ;;  %p2873_p13 = scmp.lt.s32.totalorder %s2867_s24, %s2867_s24 }
  0x1e   :  { %p2874_p0 = por %p2873_p13, %p2872_p12 }
  0x20   :  { %p2875_p1 = pnand %p2874_p0, %p2868_p11 }
  0x22   :  { %2878 = shalt.err (!%p2875_p1)
}
  0x23   :  { %s2957_s1 = smov 256   ;;  %s2958_s25 = smov 16  }
  0x24   :  { %27 = dma.hbm_to_vmem [thread:$0]  %s3343_s0, 1024, %s22_s16, [#allocation3], %s2957_s1, %s2957_s1, %s2958_s25  }
  0x25   :  { %s2959_s28 = smov [#allocation7]   ;;  %s2960_s30 = smov [#allocation8]  }
  0x26   :  { %s47_s29 = sshll.u32 %s2959_s28, 4  ;;  %s61_s8 = sshll.u32 %s2960_s30, 4  ;;  %s48_s29 = int_to_ptr.vmem [resolvable:$true] %s47_s29  ;;  %s3032_s8 = int_to_ptr.vmem [resolvable:$true] %s61_s8 }
  0x27   :  { %s2879_s13 = scalar_lea.hbm %s3346_s3, 12288 }
  0x28   :  { %p2880_p2 = scmp.ne.s32.totalorder %s3346_s3, %s2879_s13  ;;  %p2883_p3 = scmp.lt.u32.totalorder %s2879_s13, %s3346_s3 }
  0x2a   :  { %p2885_p4 = pnand %p2883_p3, %p2880_p2 }
  0x2c   :  { %2888 = shalt.err (!%p2885_p4)
}
  0x2d   :  { %s2889_s0 = scalar_lea.vmem %s48_s29, 12288  ;;  %p2894_p6 = scmp.lt.s32.totalorder %s48_s29, %s48_s29 }
  0x2e   :  { %p2890_p5 = scmp.ne.s32.totalorder %s48_s29, %s2889_s0  ;;  %p2895_p7 = scmp.lt.s32.totalorder %s2889_s0, %s2889_s0 }
  0x30   :  { %p2896_p8 = por %p2895_p7, %p2894_p6 }
  0x32   :  { %p2897_p9 = pnand %p2896_p8, %p2890_p5 }
  0x34   :  { %2900 = shalt.err (!%p2897_p9)
}
  0x35   :  { %53 = dma.hbm_to_vmem [thread:$0]  %s3346_s3, 12288, %s48_s29, [#allocation6], %s2954_s11, %s2954_s11, %s2955_s12  }
  0x36   :  { %s2901_s22 = scalar_lea.hbm %s3348_s5, 4096 }
  0x37   :  { %p2902_p10 = scmp.ne.s32.totalorder %s3348_s5, %s2901_s22  ;;  %p2905_p11 = scmp.lt.u32.totalorder %s2901_s22, %s3348_s5 }
  0x39   :  { %p2907_p12 = pnand %p2905_p11, %p2902_p10 }
  0x3b   :  { %2910 = shalt.err (!%p2907_p12)
}
  0x3c   :  { %s2911_s28 = scalar_lea.vmem %s3032_s8, 4096  ;;  %p2916_p0 = scmp.lt.s32.totalorder %s3032_s8, %s3032_s8 }
  0x3d   :  { %p2912_p13 = scmp.ne.s32.totalorder %s3032_s8, %s2911_s28  ;;  %p2917_p1 = scmp.lt.s32.totalorder %s2911_s28, %s2911_s28 }
  0x3f   :  { %p2918_p2 = por %p2917_p1, %p2916_p0 }
  0x41   :  { %p2919_p3 = pnand %p2918_p2, %p2912_p13 }
  0x43   :  { %2922 = shalt.err (!%p2919_p3)
}
  0x44   :  { %67 = dma.hbm_to_vmem [thread:$0]  %s3348_s5, 4096, %s3032_s8, [#allocation9], %s2954_s11, %s2954_s11, %s2955_s12  }
  0x45   :  { %2945 = dma.done.wait [#allocation3], 1024  }
  0x46   :  { %2946 = vsyncadd [#allocation3], 4294966272 }
  0x47   :  { %2947 = dma.done.wait [#allocation6], 24576  }
  0x48   :  { %2948 = vsyncadd [#allocation6], 4294942720 }
  0x49   :  { %2949 = dma.done.wait [#allocation9], 4096  }
  0x4a   :  { %2950 = vsyncadd [#allocation9], 4294963200  ;;  %v2491_v0 = vld [vmem:[#allocation5 + $0x104] ss:$8 sps:$4 sm:$0xff]   ;;  %v2493_v1 = vld [vmem:[#allocation5 + $0x100] ss:$8 sps:$4 sm:$0xff]  }
  0x4b   :  { %420 = vmatprep.subr.bf16.mxu0 %v2491_v0  ;;  %v2494_v2 = vld [vmem:[#allocation5 + $0x114] ss:$8 sps:$4 sm:$0xff]   ;;  %v2496_v3 = vld [vmem:[#allocation5 + $0x110] ss:$8 sps:$4 sm:$0xff]   ;;  %v2497_v4 = vld [vmem:[#allocation5 + $0x124] ss:$8 sps:$4 sm:$0xff]  }
  0x4c   :  { %421 = vmatpush1.bf16.msra.mxu0 %v2493_v1  ;;  %v2499_v5 = vld [vmem:[#allocation5 + $0x120] ss:$8 sps:$4 sm:$0xff]   ;;  %v2500_v6 = vld [vmem:[#allocation5 + $0x134] ss:$8 sps:$4 sm:$0xff]   ;;  %v2502_v7 = vld [vmem:[#allocation5 + $0x130] ss:$8 sps:$4 sm:$0xff]  }
  0x4d   :  { %422 = vmatprep.subr.bf16.mxu0 %v2494_v2  ;;  %v2503_v8 = vld [vmem:[#allocation5 + $0x144] ss:$8 sps:$4 sm:$0xff]   ;;  %v2505_v9 = vld [vmem:[#allocation5 + $0x140] ss:$8 sps:$4 sm:$0xff]   ;;  %v2506_v10 = vld [vmem:[#allocation5 + $0x154] ss:$8 sps:$4 sm:$0xff]  }
  0x4e   :  { %v2508_v11 = vld [vmem:[#allocation5 + $0x150] ss:$8 sps:$4 sm:$0xff]   ;;  %v2509_v12 = vld [vmem:[#allocation5 + $0x164] ss:$8 sps:$4 sm:$0xff]   ;;  %v2511_v16 = vld [vmem:[#allocation5 + $0x160] ss:$8 sps:$4 sm:$0xff]  }
  0x4f   :  { %v84_v13 = vld [vmem:[#allocation2 + $0x8] sm:$0xff]  ;;  %v86_v14 = vld [vmem:[#allocation2 + $0x18] sm:$0xff]  ;;  %vm131_vm0 = vcmask 1040384   ;;  %vm132_vm1 = vsmask.f32 256  ;;  %v83_v24 = vld [vmem:[#allocation2] sm:$0xff] }
  0x50   :  { %423 = vmatpush1.bf16.msra.mxu0 %v2496_v3  ;;  %v92_v15 = vpack.c.bf16 %v86_v14, %v84_v13  ;;  %v2512_v17 = vld [vmem:[#allocation5 + $0x174] ss:$8 sps:$4 sm:$0xff]   ;;  %v2514_v20 = vld [vmem:[#allocation5 + $0x170] ss:$8 sps:$4 sm:$0xff]   ;;  %vm3069_vm2 = vmand %vm131_vm0, %vm132_vm1  ;;  %vm174_vm3 = vsmask.f32 7424 }
  0x51   :  { %424 = vmatprep.subr.bf16.mxu0 %v2497_v4  ;;  %v2515_v23 = vld [vmem:[#allocation5 + $0x184] ss:$8 sps:$4 sm:$0xff]   ;;  %v85_v27 = vld [vmem:[#allocation2 + $0x10] sm:$0xff]  ;;  %v2517_v30 = vld [vmem:[#allocation5 + $0x180] ss:$8 sps:$4 sm:$0xff]   ;;  %vm694_vm4 = vcmask 1046528  }
  0x52   :  { %v103_v18 = vshrl.u32 %v92_v15, 16  ;;  %v106_v19 = vshll.u32 %v92_v15, 16  ;;  %v91_v33 = vpack.c.bf16 %v85_v27, %v83_v24  ;;  %v2518_v34 = vld [vmem:[#allocation5 + $0x194] ss:$8 sps:$4 sm:$0xff]   ;;  %v2520_v37 = vld [vmem:[#allocation5 + $0x190] ss:$8 sps:$4 sm:$0xff]  }
  0x53   :  { %v2521_v40 = vld [vmem:[#allocation5 + $0x1a4] ss:$8 sps:$4 sm:$0xff]   ;;  %v2523_v42 = vld [vmem:[#allocation5 + $0x1a0] ss:$8 sps:$4 sm:$0xff]   ;;  %v2524_v45 = vld [vmem:[#allocation5 + $0x1b4] ss:$8 sps:$4 sm:$0xff]  }
  0x54   :  { %425 = vmatpush1.bf16.msra.mxu0 %v2499_v5  ;;  %v105_v21 = vrot.slane %v103_v18, 7  ;;  %v96_v39 = vshrl.u32 %v91_v33, 16  ;;  %v99_v44 = vshll.u32 %v91_v33, 16  ;;  %v2526_v46 = vld [vmem:[#allocation5 + $0x1b0] ss:$8 sps:$4 sm:$0xff]   ;;  %v88_v48 = vld [vmem:[#allocation2 + $0x28] sm:$0xff] }
  0x55   :  { %426 = vmatprep.subr.bf16.mxu0 %v2500_v6  ;;  %v90_v49 = vld [vmem:[#allocation2 + $0x38] sm:$0xff]  ;;  %v2527_v50 = vld [vmem:[#allocation5 + $0x1c4] ss:$8 sps:$4 sm:$0xff]   ;;  %v89_v53 = vld [vmem:[#allocation2 + $0x30] sm:$0xff] }
  0x56   :  { %v108_v25 = vor.u32 %v106_v19, %v105_v21  ;;  %v3075_v26 = vsel %vm3069_vm2, %v105_v21, 0  ;;  %v98_v43 = vrot.slane %v96_v39, 7  ;;  %v94_v51 = vpack.c.bf16 %v90_v49, %v88_v48  ;;  %v87_v52 = vld [vmem:[#allocation2 + $0x20] sm:$0xff]  ;;  %v2530_v59 = vld [vmem:[#allocation5 + $0x1d4] ss:$8 sps:$4 sm:$0xff]  }
  0x57   :  { %v195_v28 = vshll.u32 %v3075_v26, 16  ;;  %v93_v56 = vpack.c.bf16 %v89_v53, %v87_v52  ;;  %v2529_v57 = vld [vmem:[#allocation5 + $0x1c0] ss:$8 sps:$4 sm:$0xff]   ;;  %v2532_v2 = vld [vmem:[#allocation5 + $0x1d0] ss:$8 sps:$4 sm:$0xff]  }
  0x58   :  { %427 = vmatpush1.bf16.msra.mxu0 %v2502_v7  ;;  %v3080_v29 = vsel %vm3069_vm2, 0, %v108_v25  ;;  %v101_v47 = vor.u32 %v99_v44, %v98_v43  ;;  %v117_v54 = vshrl.u32 %v94_v51, 16  ;;  %v120_v55 = vshll.u32 %v94_v51, 16  ;;  %v2533_v4 = vld [vmem:[#allocation5 + $0x1e4] ss:$8 sps:$4 sm:$0xff]  }
  0x59   :  { %428 = vmatprep.subr.bf16.mxu0 %v2503_v8  ;;  %v188_v31 = vshrl.u32 %v3080_v29, 16  ;;  %v190_v32 = vshll.u32 %v3080_v29, 16  ;;  %v197_v36 = vrot.slane %v195_v28, 1  ;;  %v110_v61 = vshrl.u32 %v93_v56, 16  ;;  %v2536_v13 = vld [vmem:[#allocation5 + $0x1f4] ss:$8 sps:$4 sm:$0xff]  }
  0x5a   :  { %v3087_v58 = vsel %vm3069_vm2, 0, %v101_v47  ;;  %v119_v60 = vrot.slane %v117_v54, 7  ;;  %v113_v62 = vshll.u32 %v93_v56, 16  ;;  %v3092_v3 = vsel %vm3069_vm2, %v98_v43, 0  ;;  %v2541_v24 = vld [vmem:[#allocation5 + $0x4] ss:$8 sps:$4 sm:$0xff]  }
  0x5b   :  { %v192_v35 = vrot.slane %v190_v32, 1  ;;  %v178_v63 = vshll.u32 %v3087_v58, 16  ;;  %v112_v1 = vrot.slane %v110_v61, 7  ;;  %v2539_v28 = vld [vmem:[#allocation5] ss:$8 sps:$4 sm:$0xff]   ;;  %v698_v32 = vrot.slane %v3080_v29, 1 }
  0x5c   :  { %429 = vmatpush1.bf16.msra.mxu0 %v2505_v9  ;;  %v122_v0 = vor.u32 %v120_v55, %v119_v60  ;;  %v3100_v7 = vsel %vm3069_vm2, %v119_v60, 0  ;;  %v2535_v9 = vld [vmem:[#allocation5 + $0x1e0] ss:$8 sps:$4 sm:$0xff]   ;;  %v2542_v39 = vld [vmem:[#allocation5 + $0x10] ss:$8 sps:$4 sm:$0xff]  }
  0x5d   :  { %430 = vmatprep.subr.bf16.mxu0 %v2506_v10  ;;  %v193_v38 = vor.u32 %v192_v35, %v188_v31  ;;  %v115_v6 = vor.u32 %v113_v62, %v112_v1  ;;  %v176_v10 = vshrl.u32 %v3087_v58, 16  ;;  %v3113_v21 = vsel %vm3069_vm2, %v112_v1, 0  ;;  %v2545_v43 = vld [vmem:[#allocation5 + $0x20] ss:$8 sps:$4 sm:$0xff]   ;;  %v2550_v44 = vld [vmem:[#allocation5 + $0x34] ss:$8 sps:$4 sm:$0xff]  }
  0x5e   :  { %v3096_v5 = vsel %vm3069_vm2, 0, %v122_v0  ;;  %v207_v31 = vshll.u32 %v3113_v21, 16  ;;  %v699_v35 = vrot.slane %v3075_v26, 1  ;;  %v2638_v47 = vld [vmem:[#allocation7 + $0x114] ss:$8 sps:$4 sm:$0xff]  }
  0x5f   :  { %v198_v41 = vsel %vm174_vm3, %v193_v38, %v197_v36  ;;  %v214_v8 = vshll.u32 %v3096_v5, 16  ;;  %v212_v14 = vshrl.u32 %v3096_v5, 16  ;;  %v2544_v36 = vld [vmem:[#allocation5 + $0x14] ss:$8 sps:$4 sm:$0xff]   ;;  %v2548_v48 = vld [vmem:[#allocation5 + $0x30] ss:$8 sps:$4 sm:$0xff]  }
  0x60   :  { %431 = vmatpush1.bf16.msra.mxu0 %v2508_v11  ;;  %452 = vmatprep.mubr.bf16.mxu0 %v198_v41  ;;  %v180_v11 = vrot.slane %v178_v63, 1  ;;  %v3123_v38 = vsel %vm694_vm4, %v698_v32, %v699_v35  ;;  %v209_v41 = vrot.slane %v207_v31, 1  ;;  %v2553_v49 = vld [vmem:[#allocation5 + $0x44] ss:$8 sps:$4 sm:$0xff]   ;;  %v2551_v52 = vld [vmem:[#allocation5 + $0x40] ss:$8 sps:$4 sm:$0xff]  }
  0x61   :  { %432 = vmatprep.subr.bf16.mxu0 %v2509_v12  ;;  %v183_v12 = vshll.u32 %v3092_v3, 16  ;;  %v216_v15 = vrot.slane %v214_v8, 1  ;;  %v2641_v51 = vld [vmem:[#allocation7 + $0x124] ss:$8 sps:$4 sm:$0xff]   ;;  %v2556_v53 = vld [vmem:[#allocation5 + $0x54] ss:$8 sps:$4 sm:$0xff]  }
  0x62   :  { %v181_v18 = vor.u32 %v180_v11, %v176_v10  ;;  %v2554_v54 = vld [vmem:[#allocation5 + $0x50] ss:$8 sps:$4 sm:$0xff]   ;;  %v2643_v55 = vld [vmem:[#allocation7 + $0x120] ss:$8 sps:$4 sm:$0xff]   ;;  %v2559_v56 = vld [vmem:[#allocation5 + $0x64] ss:$8 sps:$4 sm:$0xff]  }
  0x63   :  { %v185_v19 = vrot.slane %v183_v12, 1  ;;  %v217_v25 = vor.u32 %v216_v15, %v212_v14  ;;  %v2557_v60 = vld [vmem:[#allocation5 + $0x60] ss:$8 sps:$4 sm:$0xff]   ;;  %v2562_v61 = vld [vmem:[#allocation5 + $0x74] ss:$8 sps:$4 sm:$0xff]  }
  0x64   :  { %433 = vmatpush1.bf16.msra.mxu0 %v2511_v16  ;;  %v219_v16 = vshll.u32 %v3100_v7, 16  ;;  %v2649_v62 = vld [vmem:[#allocation7 + $0x140] ss:$8 sps:$4 sm:$0xff]   ;;  %v2650_v63 = vld [vmem:[#allocation7 + $0x154] ss:$8 sps:$4 sm:$0xff]  }
  0x65   :  { %434 = vmatprep.subr.bf16.mxu0 %v2512_v17  ;;  %v3109_v17 = vsel %vm3069_vm2, 0, %v115_v6  ;;  %v2560_v0 = vld [vmem:[#allocation5 + $0x70] ss:$8 sps:$4 sm:$0xff]   ;;  %v2565_v1 = vld [vmem:[#allocation5 + $0x84] ss:$8 sps:$4 sm:$0xff]  }
  0x66   :  { %v221_v27 = vrot.slane %v219_v16, 1  ;;  %v200_v33 = vshrl.u32 %v3109_v17, 16  ;;  %v2563_v6 = vld [vmem:[#allocation5 + $0x80] ss:$8 sps:$4 sm:$0xff]   ;;  %v2568_v8 = vld [vmem:[#allocation5 + $0x94] ss:$8 sps:$4 sm:$0xff]  }
  0x67   :  { %v2656_v10 = vld [vmem:[#allocation7 + $0x174] ss:$8 sps:$4 sm:$0xff]   ;;  %v2566_v11 = vld [vmem:[#allocation5 + $0x90] ss:$8 sps:$4 sm:$0xff]   ;;  %v2571_v12 = vld [vmem:[#allocation5 + $0xa4] ss:$8 sps:$4 sm:$0xff]  }
  0x68   :  { %435 = vmatpush1.bf16.msra.mxu0 %v2514_v20  ;;  %v2538_v20 = vld [vmem:[#allocation5 + $0x1f0] ss:$8 sps:$4 sm:$0xff]   ;;  %v2659_v14 = vld [vmem:[#allocation7 + $0x184] ss:$8 sps:$4 sm:$0xff]   ;;  %v2569_v15 = vld [vmem:[#allocation5 + $0xa0] ss:$8 sps:$4 sm:$0xff]  }
  0x69   :  { %436 = vmatprep.subr.bf16.mxu0 %v2515_v23  ;;  %v202_v23 = vshll.u32 %v3109_v17, 16  ;;  %v2574_v16 = vld [vmem:[#allocation5 + $0xb4] ss:$8 sps:$4 sm:$0xff]   ;;  %v2581_v31 = vld [vmem:[#allocation5 + $0xe0] ss:$8 sps:$4 sm:$0xff]  }
  0x6a   :  { %v2586_v32 = vld [vmem:[#allocation5 + $0xf4] ss:$8 sps:$4 sm:$0xff]   ;;  %v2587_v35 = vld [vmem:[#allocation5 + $0x200] ss:$8 sps:$4 sm:$0xff]  }
  0x6c   :  { %437 = vmatpush1.bf16.msra.mxu0 %v2517_v30  ;;  %v186_v30 = vsel %vm174_vm3, %v181_v18, %v185_v19  ;;  %v2661_v18 = vld [vmem:[#allocation7 + $0x180] ss:$8 sps:$4 sm:$0xff]   ;;  %v2662_v19 = vld [vmem:[#allocation7 + $0x194] ss:$8 sps:$4 sm:$0xff]  }
  0x6d   :  { %438 = vmatprep.subr.bf16.mxu0 %v2518_v34  ;;  %v204_v34 = vrot.slane %v202_v23, 1  ;;  %v2577_v23 = vld [vmem:[#allocation5 + $0xc4] ss:$8 sps:$4 sm:$0xff]  }
  0x70   :  { %439 = vmatpush1.bf16.msra.mxu0 %v2520_v37  ;;  %v222_v37 = vsel %vm174_vm3, %v217_v25, %v221_v27  ;;  %v2575_v25 = vld [vmem:[#allocation5 + $0xc0] ss:$8 sps:$4 sm:$0xff]   ;;  %v2580_v27 = vld [vmem:[#allocation5 + $0xd4] ss:$8 sps:$4 sm:$0xff]  }
  0x71   :  { %440 = vmatprep.subr.bf16.mxu0 %v2521_v40  ;;  %v205_v40 = vor.u32 %v204_v34, %v200_v33  ;;  %v2584_v33 = vld [vmem:[#allocation5 + $0xf0] ss:$8 sps:$4 sm:$0xff]   ;;  %v2589_v34 = vld [vmem:[#allocation5 + $0x204] ss:$8 sps:$4 sm:$0xff]  }
  0x73   :  { %v210_v26 = vsel %vm174_vm3, %v205_v40, %v209_v41  ;;  %v2593_v40 = vld [vmem:[#allocation5 + $0x220] ss:$8 sps:$4 sm:$0xff]   ;;  %v2598_v41 = vld [vmem:[#allocation5 + $0x234] ss:$8 sps:$4 sm:$0xff]  }
  0x74   :  { %441 = vmatpush1.bf16.msra.mxu0 %v2523_v42  ;;  %v2547_v42 = vld [vmem:[#allocation5 + $0x24] ss:$8 sps:$4 sm:$0xff]  }
  0x75   :  { %442 = vmatprep.subr.bf16.mxu0 %v2524_v45  ;;  %v2635_v45 = vld [vmem:[#allocation7 + $0x104] ss:$8 sps:$4 sm:$0xff]  }
  0x76   :  { %1318 = vmatprep.subr.bf16.mxu1 %v2635_v45  ;;  %v2602_v45 = vld [vmem:[#allocation5 + $0x250] ss:$8 sps:$4 sm:$0xff]  }
  0x78   :  { %443 = vmatpush1.bf16.msra.mxu0 %v2526_v46  ;;  %v2637_v46 = vld [vmem:[#allocation7 + $0x100] ss:$8 sps:$4 sm:$0xff]  }
  0x79   :  { %444 = vmatprep.subr.bf16.mxu0 %v2527_v50  ;;  %1319 = vmatpush1.bf16.msra.mxu1 %v2637_v46  ;;  %v2640_v50 = vld [vmem:[#allocation7 + $0x110] ss:$8 sps:$4 sm:$0xff]   ;;  %v2607_v46 = vld [vmem:[#allocation5 + $0x264] ss:$8 sps:$4 sm:$0xff]  }
  0x7a   :  { %1320 = vmatprep.subr.bf16.mxu1 %v2638_v47  ;;  %v2605_v47 = vld [vmem:[#allocation5 + $0x260] ss:$8 sps:$4 sm:$0xff]  }
  0x7c   :  { %445 = vmatpush1.bf16.msra.mxu0 %v2529_v57  ;;  %v2644_v57 = vld [vmem:[#allocation7 + $0x134] ss:$8 sps:$4 sm:$0xff]  }
  0x7d   :  { %446 = vmatprep.subr.bf16.mxu0 %v2530_v59  ;;  %1321 = vmatpush1.bf16.msra.mxu1 %v2640_v50  ;;  %v2646_v59 = vld [vmem:[#allocation7 + $0x130] ss:$8 sps:$4 sm:$0xff]   ;;  %v2613_v50 = vld [vmem:[#allocation5 + $0x284] ss:$8 sps:$4 sm:$0xff]  }
  0x7e   :  { %1322 = vmatprep.subr.bf16.mxu1 %v2641_v51  ;;  %v2616_v51 = vld [vmem:[#allocation5 + $0x294] ss:$8 sps:$4 sm:$0xff]  }
  0x80   :  { %447 = vmatpush1.bf16.msra.mxu0 %v2532_v2  ;;  %v2652_v2 = vld [vmem:[#allocation7 + $0x150] ss:$8 sps:$4 sm:$0xff]  }
  0x81   :  { %448 = vmatprep.subr.bf16.mxu0 %v2533_v4  ;;  %1323 = vmatpush1.bf16.msra.mxu1 %v2643_v55  ;;  %v2653_v4 = vld [vmem:[#allocation7 + $0x164] ss:$8 sps:$4 sm:$0xff]   ;;  %v2622_v55 = vld [vmem:[#allocation5 + $0x2b4] ss:$8 sps:$4 sm:$0xff]  }
  0x82   :  { %1324 = vmatprep.subr.bf16.mxu1 %v2644_v57  ;;  %v2625_v57 = vld [vmem:[#allocation5 + $0x2c4] ss:$8 sps:$4 sm:$0xff]  }
  0x84   :  { %449 = vmatpush1.bf16.msra.mxu0 %v2535_v9  ;;  %v2655_v9 = vld [vmem:[#allocation7 + $0x160] ss:$8 sps:$4 sm:$0xff]  }
  0x85   :  { %450 = vmatprep.subr.bf16.mxu0 %v2536_v13  ;;  %1325 = vmatpush1.bf16.msra.mxu1 %v2646_v59  ;;  %v2658_v13 = vld [vmem:[#allocation7 + $0x170] ss:$8 sps:$4 sm:$0xff]   ;;  %v2623_v59 = vld [vmem:[#allocation5 + $0x2c0] ss:$8 sps:$4 sm:$0xff]  }
  0x88   :  { %451 = vmatpush1.bf16.msra.mxu0 %v2538_v20  ;;  %v2572_v20 = vld [vmem:[#allocation5 + $0xb0] ss:$8 sps:$4 sm:$0xff]  }
  0x89   :  { %633 = vmatprep.subr.bf16.mxu0 %v2541_v24  ;;  %v2664_v24 = vld [vmem:[#allocation7 + $0x190] ss:$8 sps:$4 sm:$0xff]  }
  0x8b   :  { %453 = vmatmul.mubr.bf16.vlgmr.msra.gmra.mrb[0].mxu0 %v186_v30  ;;  %v2583_v30 = vld [vmem:[#allocation5 + $0xe4] ss:$8 sps:$4 sm:$0xff]  }
  0x8c   :  { %634 = vmatpush1.bf16.msra.mxu0 %v2539_v28  ;;  %462 = vmatprep.mubr.bf16.mxu0 %v222_v37  ;;  %v2578_v28 = vld [vmem:[#allocation5 + $0xd0] ss:$8 sps:$4 sm:$0xff]  }
  0x8d   :  { %635 = vmatprep.subr.bf16.mxu0 %v2544_v36  ;;  %v2592_v36 = vld [vmem:[#allocation5 + $0x214] ss:$8 sps:$4 sm:$0xff]   ;;  %v2590_v37 = vld [vmem:[#allocation5 + $0x210] ss:$8 sps:$4 sm:$0xff]  }
  0x90   :  { %636 = vmatpush1.bf16.msra.mxu0 %v2542_v39  ;;  %v2595_v39 = vld [vmem:[#allocation5 + $0x224] ss:$8 sps:$4 sm:$0xff]  }
  0x91   :  { %637 = vmatprep.subr.bf16.mxu0 %v2547_v42  ;;  %v2596_v42 = vld [vmem:[#allocation5 + $0x230] ss:$8 sps:$4 sm:$0xff]  }
  0x93   :  { %463 = vmatmul.mubr.bf16.gmra.mrb[4].mxu0 %v210_v26  ;;  %v2604_v26 = vld [vmem:[#allocation5 + $0x254] ss:$8 sps:$4 sm:$0xff]  }
  0x94   :  { %638 = vmatpush1.bf16.msra.mxu0 %v2545_v43  ;;  %665 = vmatprep.mubr.bf16.mxu0 %v3080_v29  ;;  %v2647_v29 = vld [vmem:[#allocation7 + $0x144] ss:$8 sps:$4 sm:$0xff]  }
  0x95   :  { %639 = vmatprep.subr.bf16.mxu0 %v2550_v44  ;;  %1326 = vmatprep.subr.bf16.mxu1 %v2647_v29  ;;  %v2601_v43 = vld [vmem:[#allocation5 + $0x244] ss:$8 sps:$4 sm:$0xff]   ;;  %v2599_v44 = vld [vmem:[#allocation5 + $0x240] ss:$8 sps:$4 sm:$0xff]   ;;  %v2628_v29 = vld [vmem:[#allocation5 + $0x2d4] ss:$8 sps:$4 sm:$0xff]  }
  0x96   :  { %1327 = vmatpush1.bf16.msra.mxu1 %v2649_v62  ;;  %v2629_v62 = vld [vmem:[#allocation5 + $0x2e0] ss:$8 sps:$4 sm:$0xff]  }
  0x97   :  { %1328 = vmatprep.subr.bf16.mxu1 %v2650_v63  ;;  %v2634_v63 = vld [vmem:[#allocation5 + $0x2f4] ss:$8 sps:$4 sm:$0xff]  }
  0x98   :  { %640 = vmatpush1.bf16.msra.mxu0 %v2548_v48  ;;  %v2610_v48 = vld [vmem:[#allocation5 + $0x274] ss:$8 sps:$4 sm:$0xff]  }
  0x99   :  { %641 = vmatprep.subr.bf16.mxu0 %v2553_v49  ;;  %v2608_v49 = vld [vmem:[#allocation5 + $0x270] ss:$8 sps:$4 sm:$0xff]  }
  0x9a   :  { %1329 = vmatpush1.bf16.msra.mxu1 %v2652_v2  ;;  %v695_v2 = vrot.slane %v3087_v58, 1 }
  0x9b   :  { %1330 = vmatprep.subr.bf16.mxu1 %v2653_v4  ;;  %v704_v4 = vrot.slane %v3096_v5, 1 }
  0x9c   :  { %642 = vmatpush1.bf16.msra.mxu0 %v2551_v52  ;;  %v2614_v52 = vld [vmem:[#allocation5 + $0x290] ss:$8 sps:$4 sm:$0xff]  }
  0x9d   :  { %643 = vmatprep.subr.bf16.mxu0 %v2556_v53  ;;  %v2619_v53 = vld [vmem:[#allocation5 + $0x2a4] ss:$8 sps:$4 sm:$0xff]  }
  0x9e   :  { %1331 = vmatpush1.bf16.msra.mxu1 %v2655_v9 }
  0x9f   :  { %1332 = vmatprep.subr.bf16.mxu1 %v2656_v10  ;;  %v701_v10 = vrot.slane %v3109_v17, 1 }
  0xa0   :  { %644 = vmatpush1.bf16.msra.mxu0 %v2554_v54  ;;  %v2617_v54 = vld [vmem:[#allocation5 + $0x2a0] ss:$8 sps:$4 sm:$0xff]  }
  0xa1   :  { %645 = vmatprep.subr.bf16.mxu0 %v2559_v56  ;;  %v2620_v56 = vld [vmem:[#allocation5 + $0x2b0] ss:$8 sps:$4 sm:$0xff]  }
  0xa2   :  { %1333 = vmatpush1.bf16.msra.mxu1 %v2658_v13  ;;  %v2671_v13 = vld [vmem:[#allocation7 + $0x1c4] ss:$8 sps:$4 sm:$0xff]  }
  0xa3   :  { %1334 = vmatprep.subr.bf16.mxu1 %v2659_v14  ;;  %v2673_v14 = vld [vmem:[#allocation7 + $0x1c0] ss:$8 sps:$4 sm:$0xff]  }
  0xa4   :  { %646 = vmatpush1.bf16.msra.mxu0 %v2557_v60  ;;  %v2626_v60 = vld [vmem:[#allocation5 + $0x2d0] ss:$8 sps:$4 sm:$0xff]  }
  0xa5   :  { %647 = vmatprep.subr.bf16.mxu0 %v2562_v61  ;;  %v2631_v61 = vld [vmem:[#allocation5 + $0x2e4] ss:$8 sps:$4 sm:$0xff]  }
  0xa6   :  { %1335 = vmatpush1.bf16.msra.mxu1 %v2661_v18  ;;  %v2680_v18 = vld [vmem:[#allocation7 + $0x1f4] ss:$8 sps:$4 sm:$0xff]  }
  0xa7   :  { %1336 = vmatprep.subr.bf16.mxu1 %v2662_v19  ;;  %v2682_v19 = vld [vmem:[#allocation7 + $0x1f0] ss:$8 sps:$4 sm:$0xff]  }
  0xa8   :  { %648 = vmatpush1.bf16.msra.mxu0 %v2560_v0  ;;  %v696_v0 = vrot.slane %v3092_v3, 1  ;;  %v702_v3 = vrot.slane %v3113_v21, 1  ;;  %v2679_v21 = vld [vmem:[#allocation7 + $0x1e0] ss:$8 sps:$4 sm:$0xff]  }
  0xa9   :  { %649 = vmatprep.subr.bf16.mxu0 %v2565_v1  ;;  %v2632_v1 = vld [vmem:[#allocation5 + $0x2f0] ss:$8 sps:$4 sm:$0xff]  }
  0xaa   :  { %1337 = vmatpush1.bf16.msra.mxu1 %v2664_v24 }
  0xac   :  { %650 = vmatpush1.bf16.msra.mxu0 %v2563_v6  ;;  %v705_v6 = vrot.slane %v3100_v7, 1  ;;  %v2670_v7 = vld [vmem:[#allocation7 + $0x1b0] ss:$8 sps:$4 sm:$0xff]  }
  0xad   :  { %651 = vmatprep.subr.bf16.mxu0 %v2568_v8  ;;  %v697_v8 = vsel %vm694_vm4, %v695_v2, %v696_v0 }
  0xae   :  { %v706_v9 = vsel %vm694_vm4, %v704_v4, %v705_v6 }
  0xb0   :  { %652 = vmatpush1.bf16.msra.mxu0 %v2566_v11  ;;  %v703_v11 = vsel %vm694_vm4, %v701_v10, %v702_v3 }
  0xb1   :  { %653 = vmatprep.subr.bf16.mxu0 %v2571_v12  ;;  %v2667_v12 = vld [vmem:[#allocation7 + $0x1a0] ss:$8 sps:$4 sm:$0xff]  }
  0xb4   :  { %654 = vmatpush1.bf16.msra.mxu0 %v2569_v15  ;;  %v2674_v15 = vld [vmem:[#allocation7 + $0x1d4] ss:$8 sps:$4 sm:$0xff]  }
  0xb5   :  { %655 = vmatprep.subr.bf16.mxu0 %v2574_v16  ;;  %v2676_v16 = vld [vmem:[#allocation7 + $0x1d0] ss:$8 sps:$4 sm:$0xff]  }
  0xb8   :  { %656 = vmatpush1.bf16.msra.mxu0 %v2572_v20  ;;  %v2685_v20 = vld [vmem:[#allocation7 + $0x4] ss:$8 sps:$4 sm:$0xff]  }
  0xb9   :  { %657 = vmatprep.subr.bf16.mxu0 %v2577_v23  ;;  %v967_v23 = vlaneseq }
  0xbb   :  { %v968_v24 = vshrl.u32 %v967_v23, 7 }
  0xbc   :  { %658 = vmatpush1.bf16.msra.mxu0 %v2575_v25 }
  0xbd   :  { %659 = vmatprep.subr.bf16.mxu0 %v2580_v27  ;;  %v3140_v25 = vsub.s32 0, %v968_v24  ;;  %v965_v27 = vld [vmem:[%s3345_s2] sm:$0x3] }
  0xc0   :  { %660 = vmatpush1.bf16.msra.mxu0 %v2578_v28  ;;  %v3145_v28 = vsub.s32 1, %v968_v24 }
  0xc1   :  { %661 = vmatprep.subr.bf16.mxu0 %v2583_v30  ;;  %v970_v30 = vrot.slane %v965_v27, %v3140_v25 }
  0xc4   :  { %662 = vmatpush1.bf16.msra.mxu0 %v2581_v31  ;;  %v974_v31 = vrot.slane %v965_v27, %v3145_v28 }
  0xc5   :  { %663 = vmatprep.subr.bf16.mxu0 %v2586_v32 }
  0xc8   :  { %664 = vmatpush1.bf16.msra.mxu0 %v2584_v33 }
  0xc9   :  { %904 = vmatprep.subr.bf16.mxu0 %v2589_v34 }
  0xcb   :  { %666 = vmatmul.mubr.bf16.vlgmr.msra.gmra.mrb[0].mxu0 %v3087_v58  ;;  %v2665_v58 = vld [vmem:[#allocation7 + $0x1a4] ss:$8 sps:$4 sm:$0xff]  }
  0xcc   :  { %905 = vmatpush1.bf16.msra.mxu0 %v2587_v35  ;;  %675 = vmatprep.mubr.bf16.mxu0 %v3096_v5  ;;  %v2668_v5 = vld [vmem:[#allocation7 + $0x1b4] ss:$8 sps:$4 sm:$0xff]  }
  0xcd   :  { %906 = vmatprep.subr.bf16.mxu0 %v2592_v36  ;;  %1338 = vmatprep.subr.bf16.mxu1 %v2665_v58 }
  0xce   :  { %1339 = vmatpush1.bf16.msra.mxu1 %v2667_v12 }
  0xcf   :  { %1340 = vmatprep.subr.bf16.mxu1 %v2668_v5 }
  0xd0   :  { %907 = vmatpush1.bf16.msra.mxu0 %v2590_v37 }
  0xd1   :  { %908 = vmatprep.subr.bf16.mxu0 %v2595_v39 }
  0xd2   :  { %1341 = vmatpush1.bf16.msra.mxu1 %v2670_v7 }
  0xd3   :  { %676 = vmatmul.mubr.bf16.gmra.mrb[4].mxu0 %v3109_v17  ;;  %1342 = vmatprep.subr.bf16.mxu1 %v2671_v13  ;;  %v2677_v17 = vld [vmem:[#allocation7 + $0x1e4] ss:$8 sps:$4 sm:$0xff]  }
  0xd4   :  { %909 = vmatpush1.bf16.msra.mxu0 %v2593_v40  ;;  %936 = vmatprep.mubr.bf16.mxu0 %v3123_v38  ;;  %v2611_v38 = vld [vmem:[#allocation5 + $0x280] ss:$8 sps:$4 sm:$0xff]  }
  0xd5   :  { %910 = vmatprep.subr.bf16.mxu0 %v2598_v41 }
  0xd6   :  { %1343 = vmatpush1.bf16.msra.mxu1 %v2673_v14 }
  0xd7   :  { %1344 = vmatprep.subr.bf16.mxu1 %v2674_v15 }
  0xd8   :  { %911 = vmatpush1.bf16.msra.mxu0 %v2596_v42 }
  0xd9   :  { %912 = vmatprep.subr.bf16.mxu0 %v2601_v43 }
  0xda   :  { %1345 = vmatpush1.bf16.msra.mxu1 %v2676_v16 }
  0xdb   :  { %1346 = vmatprep.subr.bf16.mxu1 %v2677_v17 }
  0xdc   :  { %913 = vmatpush1.bf16.msra.mxu0 %v2599_v44 }
  0xdd   :  { %914 = vmatprep.subr.bf16.mxu0 %v2604_v26 }
  0xde   :  { %1347 = vmatpush1.bf16.msra.mxu1 %v2679_v21 }
  0xdf   :  { %1348 = vmatprep.subr.bf16.mxu1 %v2680_v18 }
  0xe0   :  { %915 = vmatpush1.bf16.msra.mxu0 %v2602_v45 }
  0xe1   :  { %916 = vmatprep.subr.bf16.mxu0 %v2607_v46 }
  0xe2   :  { %1349 = vmatpush1.bf16.msra.mxu1 %v2682_v19 }
  0xe3   :  { %1531 = vmatprep.subr.bf16.mxu1 %v2685_v20 }
  0xe4   :  { %917 = vmatpush1.bf16.msra.mxu0 %v2605_v47 }
  0xe5   :  { %918 = vmatprep.subr.bf16.mxu0 %v2610_v48 }
  0xe8   :  { %919 = vmatpush1.bf16.msra.mxu0 %v2608_v49 }
  0xe9   :  { %920 = vmatprep.subr.bf16.mxu0 %v2613_v50 }
  0xec   :  { %921 = vmatpush1.bf16.msra.mxu0 %v2611_v38 }
  0xed   :  { %922 = vmatprep.subr.bf16.mxu0 %v2616_v51 }
  0xf0   :  { %923 = vmatpush1.bf16.msra.mxu0 %v2614_v52 }
  0xf1   :  { %924 = vmatprep.subr.bf16.mxu0 %v2619_v53 }
  0xf4   :  { %925 = vmatpush1.bf16.msra.mxu0 %v2617_v54 }
  0xf5   :  { %926 = vmatprep.subr.bf16.mxu0 %v2622_v55 }
  0xf8   :  { %927 = vmatpush1.bf16.msra.mxu0 %v2620_v56 }
  0xf9   :  { %928 = vmatprep.subr.bf16.mxu0 %v2625_v57 }
  0xfc   :  { %929 = vmatpush1.bf16.msra.mxu0 %v2623_v59 }
  0xfd   :  { %930 = vmatprep.subr.bf16.mxu0 %v2628_v29 }
 0x100   :  { %931 = vmatpush1.bf16.msra.mxu0 %v2626_v60 }
 0x101   :  { %932 = vmatprep.subr.bf16.mxu0 %v2631_v61 }
 0x104   :  { %933 = vmatpush1.bf16.msra.mxu0 %v2629_v62 }
 0x105   :  { %934 = vmatprep.subr.bf16.mxu0 %v2634_v63 }
 0x108   :  { %935 = vmatpush1.bf16.msra.mxu0 %v2632_v1 }
 0x10b   :  { %937 = vmatmul.mubr.bf16.vlgmr.msra.gmra.mrb[0].mxu0 %v697_v8 }
 0x10c   :  { %946 = vmatprep.mubr.bf16.mxu0 %v706_v9 }
 0x113   :  { %947 = vmatmul.mubr.bf16.gmra.mrb[4].mxu0 %v703_v11 }
 0x1de   :  { %v938_v32 = vpop.f32.mrb[0].mxu0 }
 0x1df   :  { %v977_v33 = vadd.f32 %v970_v30, %v938_v32  ;;  %v940_v34 = vpop.f32.mrb[1].mxu0 }
 0x1e0   :  { %v978_v35 = vadd.f32 %v974_v31, %v940_v34  ;;  %v942_v36 = vpop.f32.mrb[2].mxu0 }
 0x1e1   :  { %v979_v37 = vadd.f32 %v970_v30, %v942_v36  ;;  %v944_v39 = vpop.f32.mrb[3].mxu0  ;;  %v985_v41 = vmax.f32 %v977_v33, 0.0  ;;  %v2683_v33 = vld [vmem:[#allocation7] ss:$8 sps:$4 sm:$0xff]  }
 0x1e2   :  { %v980_v40 = vadd.f32 %v974_v31, %v944_v39  ;;  %v986_v43 = vmax.f32 %v978_v35, 0.0  ;;  %v2688_v39 = vld [vmem:[#allocation7 + $0x14] ss:$8 sps:$4 sm:$0xff]  }
 0x1e3   :  { %v987_v42 = vmax.f32 %v979_v37, 0.0 }
 0x1e4   :  { %v988_v44 = vmax.f32 %v980_v40, 0.0 }
 0x1e5   :  { %v993_v26 = vpack.c.bf16 %v987_v42, %v985_v41 }
 0x1e6   :  { %v994_v45 = vpack.c.bf16 %v988_v44, %v986_v43  ;;  %v948_v46 = vpop.f32.mrb[4].mxu0 }
 0x1e7   :  { %v998_v47 = vshrl.u32 %v993_v26, 16  ;;  %v981_v48 = vadd.f32 %v970_v30, %v948_v46  ;;  %v950_v49 = vpop.f32.mrb[5].mxu0  ;;  %v1001_v53 = vshll.u32 %v993_v26, 16 }
 0x1e8   :  { %v1005_v50 = vshrl.u32 %v994_v45, 16  ;;  %v982_v38 = vadd.f32 %v974_v31, %v950_v49  ;;  %v952_v51 = vpop.f32.mrb[6].mxu0  ;;  %v1008_v57 = vshll.u32 %v994_v45, 16  ;;  %v2686_v45 = vld [vmem:[#allocation7 + $0x10] ss:$8 sps:$4 sm:$0xff]  }
 0x1e9   :  { %v1000_v52 = vrot.slane %v998_v47, 7  ;;  %v983_v54 = vadd.f32 %v970_v30, %v952_v51  ;;  %v954_v55 = vpop.f32.mrb[7].mxu0  ;;  %v989_v60 = vmax.f32 %v981_v48, 0.0 }
 0x1ea   :  { %v1007_v56 = vrot.slane %v1005_v50, 7  ;;  %v984_v59 = vadd.f32 %v974_v31, %v954_v55  ;;  %v990_v61 = vmax.f32 %v982_v38, 0.0  ;;  %v2691_v50 = vld [vmem:[#allocation7 + $0x24] ss:$8 sps:$4 sm:$0xff]  }
 0x1eb   :  { %v1003_v29 = vor.u32 %v1001_v53, %v1000_v52  ;;  %v991_v62 = vmax.f32 %v983_v54, 0.0  ;;  %v3151_v63 = vsel %vm3069_vm2, %v1000_v52, 0  ;;  %v2689_v53 = vld [vmem:[#allocation7 + $0x20] ss:$8 sps:$4 sm:$0xff]  }
 0x1ec   :  { %v1010_v0 = vor.u32 %v1008_v57, %v1007_v56  ;;  %v992_v1 = vmax.f32 %v984_v59, 0.0  ;;  %v1038_v2 = vsel %vm3069_vm2, %v1007_v56, 0  ;;  %v1081_v12 = vshll.u32 %v3151_v63, 16  ;;  %v2694_v56 = vld [vmem:[#allocation7 + $0x34] ss:$8 sps:$4 sm:$0xff]  }
 0x1ed   :  { %v3157_v4 = vsel %vm3069_vm2, 0, %v1003_v29  ;;  %v995_v6 = vpack.c.bf16 %v991_v62, %v989_v60  ;;  %v1093_v58 = vshll.u32 %v1038_v2, 16  ;;  %v1596_v30 = vrot.slane %v1038_v2, 1  ;;  %v3193_v59 = vld [vmem:[#allocation8] ss:$8 sps:$4 sm:$0xff]  }
 0x1ee   :  { %v1034_v8 = vsel %vm3069_vm2, 0, %v1010_v0  ;;  %v996_v9 = vpack.c.bf16 %v992_v1, %v990_v61  ;;  %v1076_v10 = vshll.u32 %v3157_v4, 16  ;;  %v1074_v13 = vshrl.u32 %v3157_v4, 16  ;;  %v3195_v29 = vld [vmem:[#allocation8 + $0x4] ss:$8 sps:$4 sm:$0xff]  }
 0x1ef   :  { %v1012_v3 = vshrl.u32 %v995_v6, 16  ;;  %v1088_v11 = vshll.u32 %v1034_v8, 16  ;;  %v1015_v5 = vshll.u32 %v995_v6, 16  ;;  %v1086_v16 = vshrl.u32 %v1034_v8, 16  ;;  %v2692_v60 = vld [vmem:[#allocation7 + $0x30] ss:$8 sps:$4 sm:$0xff]   ;;  %2098 = vmatprep.subr.bf16.mxu0 %v3195_v29 }
 0x1f0   :  { %v1019_v7 = vshrl.u32 %v996_v9, 16  ;;  %v1078_v14 = vrot.slane %v1076_v10, 1  ;;  %v1595_v21 = vrot.slane %v1034_v8, 1  ;;  %v1022_v19 = vshll.u32 %v996_v9, 16  ;;  %v3197_v61 = vld [vmem:[#allocation8 + $0x14] ss:$8 sps:$4 sm:$0xff]   ;;  %2099 = vmatpush1.bf16.msra.mxu0 %v3193_v59 }
 0x1f1   :  { %v1014_v15 = vrot.slane %v1012_v3, 7  ;;  %v1090_v17 = vrot.slane %v1088_v11, 1  ;;  %v1095_v27 = vrot.slane %v1093_v58, 1  ;;  %v1083_v34 = vrot.slane %v1081_v12, 1  ;;  %v2697_v62 = vld [vmem:[#allocation7 + $0x44] ss:$8 sps:$4 sm:$0xff]   ;;  %2100 = vmatprep.subr.bf16.mxu0 %v3197_v61 }
 0x1f2   :  { %v1021_v18 = vrot.slane %v1019_v7, 7  ;;  %v1079_v20 = vor.u32 %v1078_v14, %v1074_v13  ;;  %v3178_v40 = vsel %vm694_vm4, %v1595_v21, %v1596_v30  ;;  %v3201_v0 = vld [vmem:[#allocation8 + $0x10] ss:$8 sps:$4 sm:$0xff]   ;;  %v3204_v1 = vld [vmem:[#allocation8 + $0x24] ss:$8 sps:$4 sm:$0xff]  }
 0x1f3   :  { %v1017_v23 = vor.u32 %v1015_v5, %v1014_v15  ;;  %v1091_v24 = vor.u32 %v1090_v17, %v1086_v16  ;;  %v3174_v36 = vsel %vm3069_vm2, %v1014_v15, 0  ;;  %v2695_v2 = vld [vmem:[#allocation7 + $0x40] ss:$8 sps:$4 sm:$0xff]   ;;  %v2700_v6 = vld [vmem:[#allocation7 + $0x54] ss:$8 sps:$4 sm:$0xff]  }
 0x1f4   :  { %v1024_v31 = vor.u32 %v1022_v19, %v1021_v18  ;;  %v3166_v32 = vsel %vm3069_vm2, %v1021_v18, 0  ;;  %v1084_v42 = vsel %vm174_vm3, %v1079_v20, %v1083_v34  ;;  %v1105_v48 = vshll.u32 %v3174_v36, 16  ;;  %2101 = vmatpush1.bf16.msra.mxu0 %v3201_v0  ;;  %v3210_v9 = vld [vmem:[#allocation8 + $0x34] ss:$8 sps:$4 sm:$0xff]   ;;  %v2698_v10 = vld [vmem:[#allocation7 + $0x50] ss:$8 sps:$4 sm:$0xff]  }
 0x1f5   :  { %v3170_v35 = vsel %vm3069_vm2, 0, %v1017_v23  ;;  %v1096_v37 = vsel %vm174_vm3, %v1091_v24, %v1095_v27  ;;  %v1117_v26 = vshll.u32 %v3166_v32, 16  ;;  %2102 = vmatprep.subr.bf16.mxu0 %v3204_v1  ;;  %v2703_v3 = vld [vmem:[#allocation7 + $0x64] ss:$8 sps:$4 sm:$0xff]   ;;  %v3213_v11 = vld [vmem:[#allocation8 + $0x30] ss:$8 sps:$4 sm:$0xff]  }
 0x1f6   :  { %v3182_v41 = vsel %vm3069_vm2, 0, %v1024_v31  ;;  %1350 = vmatprep.mubr.bf16.mxu1 %v1096_v37  ;;  %v1100_v43 = vshll.u32 %v3170_v35, 16  ;;  %v1098_v46 = vshrl.u32 %v3170_v35, 16  ;;  %v1107_v54 = vrot.slane %v1105_v48, 1  ;;  %v3216_v58 = vld [vmem:[#allocation8 + $0x44] ss:$8 sps:$4 sm:$0xff]  }
 0x1f7   :  { %1351 = vmatmul.mubr.bf16.vlgmr.msra.gmra.mrb[0].mxu1 %v1084_v42  ;;  %v1112_v44 = vshll.u32 %v3182_v41, 16  ;;  %v1110_v22 = vshrl.u32 %v3182_v41, 16  ;;  %v1119_v52 = vrot.slane %v1117_v26, 1  ;;  %v2701_v12 = vld [vmem:[#allocation7 + $0x60] ss:$8 sps:$4 sm:$0xff]  }
 0x1f8   :  { %1532 = vmatpush1.bf16.msra.mxu1 %v2683_v33  ;;  %v1102_v47 = vrot.slane %v1100_v43, 1  ;;  %v2706_v5 = vld [vmem:[#allocation7 + $0x74] ss:$8 sps:$4 sm:$0xff]   ;;  %v3219_v7 = vld [vmem:[#allocation8 + $0x40] ss:$8 sps:$4 sm:$0xff]  }
 0x1f9   :  { %1533 = vmatprep.subr.bf16.mxu1 %v2688_v39  ;;  %v1114_v49 = vrot.slane %v1112_v44, 1  ;;  %v3222_v13 = vld [vmem:[#allocation8 + $0x54] ss:$8 sps:$4 sm:$0xff]   ;;  %v2704_v14 = vld [vmem:[#allocation7 + $0x70] ss:$8 sps:$4 sm:$0xff]  }
 0x1fa   :  { %v1103_v38 = vor.u32 %v1102_v47, %v1098_v46  ;;  %v2709_v15 = vld [vmem:[#allocation7 + $0x84] ss:$8 sps:$4 sm:$0xff]   ;;  %v3225_v16 = vld [vmem:[#allocation8 + $0x50] ss:$8 sps:$4 sm:$0xff]   ;;  %v2707_v21 = vld [vmem:[#allocation7 + $0x80] ss:$8 sps:$4 sm:$0xff]  }
 0x1fb   :  { %v1115_v51 = vor.u32 %v1114_v49, %v1110_v22  ;;  %v3228_v17 = vld [vmem:[#allocation8 + $0x64] ss:$8 sps:$4 sm:$0xff]   ;;  %v2712_v18 = vld [vmem:[#allocation7 + $0x94] ss:$8 sps:$4 sm:$0xff]   ;;  %v3231_v19 = vld [vmem:[#allocation8 + $0x60] ss:$8 sps:$4 sm:$0xff]  }
 0x1fc   :  { %1534 = vmatpush1.bf16.msra.mxu1 %v2686_v45  ;;  %v1108_v57 = vsel %vm174_vm3, %v1103_v38, %v1107_v54  ;;  %v3234_v20 = vld [vmem:[#allocation8 + $0x74] ss:$8 sps:$4 sm:$0xff]   ;;  %v2710_v23 = vld [vmem:[#allocation7 + $0x90] ss:$8 sps:$4 sm:$0xff]   ;;  %v2715_v24 = vld [vmem:[#allocation7 + $0xa4] ss:$8 sps:$4 sm:$0xff]  }
 0x1fd   :  { %v1120_v55 = vsel %vm174_vm3, %v1115_v51, %v1119_v52  ;;  %1535 = vmatprep.subr.bf16.mxu1 %v2691_v50  ;;  %v3237_v27 = vld [vmem:[#allocation8 + $0x70] ss:$8 sps:$4 sm:$0xff]   ;;  %v3240_v30 = vld [vmem:[#allocation8 + $0x84] ss:$8 sps:$4 sm:$0xff]   ;;  %v2713_v31 = vld [vmem:[#allocation7 + $0xa0] ss:$8 sps:$4 sm:$0xff]  }
 0x1fe   :  { %1360 = vmatprep.mubr.bf16.mxu1 %v1120_v55  ;;  %v2718_v33 = vld [vmem:[#allocation7 + $0xb4] ss:$8 sps:$4 sm:$0xff]   ;;  %v3243_v34 = vld [vmem:[#allocation8 + $0x80] ss:$8 sps:$4 sm:$0xff]   ;;  %v2716_v39 = vld [vmem:[#allocation7 + $0xb0] ss:$8 sps:$4 sm:$0xff]  }
 0x1ff   :  { %1361 = vmatmul.mubr.bf16.gmra.mrb[4].mxu1 %v1108_v57  ;;  %v3246_v37 = vld [vmem:[#allocation8 + $0x94] ss:$8 sps:$4 sm:$0xff]   ;;  %v2721_v42 = vld [vmem:[#allocation7 + $0xc4] ss:$8 sps:$4 sm:$0xff]   ;;  %v3249_v43 = vld [vmem:[#allocation8 + $0x90] ss:$8 sps:$4 sm:$0xff]  }
 0x200   :  { %1536 = vmatpush1.bf16.msra.mxu1 %v2689_v53  ;;  %1563 = vmatprep.mubr.bf16.mxu1 %v1034_v8  ;;  %v3207_v8 = vld [vmem:[#allocation8 + $0x20] ss:$8 sps:$4 sm:$0xff]   ;;  %v3252_v44 = vld [vmem:[#allocation8 + $0xa4] ss:$8 sps:$4 sm:$0xff]   ;;  %v2724_v45 = vld [vmem:[#allocation7 + $0xd4] ss:$8 sps:$4 sm:$0xff]  }
 0x201   :  { %1537 = vmatprep.subr.bf16.mxu1 %v2694_v56  ;;  %2103 = vmatpush1.bf16.msra.mxu0 %v3207_v8  ;;  %v2719_v26 = vld [vmem:[#allocation7 + $0xc0] ss:$8 sps:$4 sm:$0xff]   ;;  %v3258_v47 = vld [vmem:[#allocation8 + $0xb4] ss:$8 sps:$4 sm:$0xff]   ;;  %v2722_v48 = vld [vmem:[#allocation7 + $0xd0] ss:$8 sps:$4 sm:$0xff]  }
 0x202   :  { %2104 = vmatprep.subr.bf16.mxu0 %v3210_v9  ;;  %v3255_v46 = vld [vmem:[#allocation8 + $0xa0] ss:$8 sps:$4 sm:$0xff]   ;;  %v2727_v22 = vld [vmem:[#allocation7 + $0xe4] ss:$8 sps:$4 sm:$0xff]   ;;  %v3261_v49 = vld [vmem:[#allocation8 + $0xb0] ss:$8 sps:$4 sm:$0xff]  }
 0x203   :  { %v3264_v50 = vld [vmem:[#allocation8 + $0xc4] ss:$8 sps:$4 sm:$0xff]   ;;  %v2725_v38 = vld [vmem:[#allocation7 + $0xe0] ss:$8 sps:$4 sm:$0xff]   ;;  %v2730_v51 = vld [vmem:[#allocation7 + $0xf4] ss:$8 sps:$4 sm:$0xff]  }
 0x204   :  { %1538 = vmatpush1.bf16.msra.mxu1 %v2692_v60  ;;  %v3267_v52 = vld [vmem:[#allocation8 + $0xc0] ss:$8 sps:$4 sm:$0xff]   ;;  %v3270_v53 = vld [vmem:[#allocation8 + $0xd4] ss:$8 sps:$4 sm:$0xff]   ;;  %v2728_v54 = vld [vmem:[#allocation7 + $0xf0] ss:$8 sps:$4 sm:$0xff]  }
 0x205   :  { %1539 = vmatprep.subr.bf16.mxu1 %v2697_v62  ;;  %2105 = vmatpush1.bf16.msra.mxu0 %v3213_v11  ;;  %v2733_v55 = vld [vmem:[#allocation7 + $0x204] ss:$8 sps:$4 sm:$0xff]   ;;  %v3273_v56 = vld [vmem:[#allocation8 + $0xd0] ss:$8 sps:$4 sm:$0xff]   ;;  %v2731_v57 = vld [vmem:[#allocation7 + $0x200] ss:$8 sps:$4 sm:$0xff]  }
 0x206   :  { %2106 = vmatprep.subr.bf16.mxu0 %v3216_v58  ;;  %v2736_v60 = vld [vmem:[#allocation7 + $0x214] ss:$8 sps:$4 sm:$0xff]   ;;  %v2734_v62 = vld [vmem:[#allocation7 + $0x210] ss:$8 sps:$4 sm:$0xff]  }
 0x208   :  { %1540 = vmatpush1.bf16.msra.mxu1 %v2695_v2  ;;  %v2739_v2 = vld [vmem:[#allocation7 + $0x224] ss:$8 sps:$4 sm:$0xff]  }
 0x209   :  { %1541 = vmatprep.subr.bf16.mxu1 %v2700_v6  ;;  %2107 = vmatpush1.bf16.msra.mxu0 %v3219_v7  ;;  %v2737_v6 = vld [vmem:[#allocation7 + $0x220] ss:$8 sps:$4 sm:$0xff]  }
 0x20a   :  { %2108 = vmatprep.subr.bf16.mxu0 %v3222_v13 }
 0x20c   :  { %1542 = vmatpush1.bf16.msra.mxu1 %v2698_v10  ;;  %v2742_v10 = vld [vmem:[#allocation7 + $0x234] ss:$8 sps:$4 sm:$0xff]  }
 0x20d   :  { %1543 = vmatprep.subr.bf16.mxu1 %v2703_v3  ;;  %2109 = vmatpush1.bf16.msra.mxu0 %v3225_v16  ;;  %v2740_v3 = vld [vmem:[#allocation7 + $0x230] ss:$8 sps:$4 sm:$0xff]  }
 0x20e   :  { %2110 = vmatprep.subr.bf16.mxu0 %v3228_v17 }
 0x210   :  { %1544 = vmatpush1.bf16.msra.mxu1 %v2701_v12  ;;  %v2745_v12 = vld [vmem:[#allocation7 + $0x244] ss:$8 sps:$4 sm:$0xff]  }
 0x211   :  { %1545 = vmatprep.subr.bf16.mxu1 %v2706_v5  ;;  %2111 = vmatpush1.bf16.msra.mxu0 %v3231_v19  ;;  %v2743_v5 = vld [vmem:[#allocation7 + $0x240] ss:$8 sps:$4 sm:$0xff]  }
 0x212   :  { %2112 = vmatprep.subr.bf16.mxu0 %v3234_v20 }
 0x214   :  { %1546 = vmatpush1.bf16.msra.mxu1 %v2704_v14  ;;  %v2748_v14 = vld [vmem:[#allocation7 + $0x254] ss:$8 sps:$4 sm:$0xff]  }
 0x215   :  { %1547 = vmatprep.subr.bf16.mxu1 %v2709_v15  ;;  %2113 = vmatpush1.bf16.msra.mxu0 %v3237_v27  ;;  %v2746_v15 = vld [vmem:[#allocation7 + $0x250] ss:$8 sps:$4 sm:$0xff]  }
 0x216   :  { %2114 = vmatprep.subr.bf16.mxu0 %v3240_v30 }
 0x218   :  { %1548 = vmatpush1.bf16.msra.mxu1 %v2707_v21  ;;  %v2751_v21 = vld [vmem:[#allocation7 + $0x264] ss:$8 sps:$4 sm:$0xff]  }
 0x219   :  { %1549 = vmatprep.subr.bf16.mxu1 %v2712_v18  ;;  %2115 = vmatpush1.bf16.msra.mxu0 %v3243_v34  ;;  %v2749_v18 = vld [vmem:[#allocation7 + $0x260] ss:$8 sps:$4 sm:$0xff]  }
 0x21a   :  { %2116 = vmatprep.subr.bf16.mxu0 %v3246_v37 }
 0x21c   :  { %1550 = vmatpush1.bf16.msra.mxu1 %v2710_v23  ;;  %v2754_v23 = vld [vmem:[#allocation7 + $0x274] ss:$8 sps:$4 sm:$0xff]  }
 0x21d   :  { %1551 = vmatprep.subr.bf16.mxu1 %v2715_v24  ;;  %2117 = vmatpush1.bf16.msra.mxu0 %v3249_v43  ;;  %v2752_v24 = vld [vmem:[#allocation7 + $0x270] ss:$8 sps:$4 sm:$0xff]  }
 0x21e   :  { %2118 = vmatprep.subr.bf16.mxu0 %v3252_v44 }
 0x220   :  { %1552 = vmatpush1.bf16.msra.mxu1 %v2713_v31  ;;  %v2757_v31 = vld [vmem:[#allocation7 + $0x284] ss:$8 sps:$4 sm:$0xff]  }
 0x221   :  { %1553 = vmatprep.subr.bf16.mxu1 %v2718_v33  ;;  %2119 = vmatpush1.bf16.msra.mxu0 %v3255_v46  ;;  %v2760_v33 = vld [vmem:[#allocation7 + $0x294] ss:$8 sps:$4 sm:$0xff]  }
 0x222   :  { %2120 = vmatprep.subr.bf16.mxu0 %v3258_v47 }
 0x224   :  { %1554 = vmatpush1.bf16.msra.mxu1 %v2716_v39  ;;  %v2758_v39 = vld [vmem:[#allocation7 + $0x290] ss:$8 sps:$4 sm:$0xff]  }
 0x225   :  { %1555 = vmatprep.subr.bf16.mxu1 %v2721_v42  ;;  %2121 = vmatpush1.bf16.msra.mxu0 %v3261_v49  ;;  %v2763_v42 = vld [vmem:[#allocation7 + $0x2a4] ss:$8 sps:$4 sm:$0xff]  }
 0x226   :  { %2122 = vmatprep.subr.bf16.mxu0 %v3264_v50 }
 0x228   :  { %1556 = vmatpush1.bf16.msra.mxu1 %v2719_v26  ;;  %v2761_v26 = vld [vmem:[#allocation7 + $0x2a0] ss:$8 sps:$4 sm:$0xff]  }
 0x229   :  { %1557 = vmatprep.subr.bf16.mxu1 %v2724_v45  ;;  %2123 = vmatpush1.bf16.msra.mxu0 %v3267_v52  ;;  %v2766_v45 = vld [vmem:[#allocation7 + $0x2b4] ss:$8 sps:$4 sm:$0xff]  }
 0x22a   :  { %2124 = vmatprep.subr.bf16.mxu0 %v3270_v53 }
 0x22c   :  { %1558 = vmatpush1.bf16.msra.mxu1 %v2722_v48  ;;  %v2764_v48 = vld [vmem:[#allocation7 + $0x2b0] ss:$8 sps:$4 sm:$0xff]  }
 0x22d   :  { %1559 = vmatprep.subr.bf16.mxu1 %v2727_v22  ;;  %2125 = vmatpush1.bf16.msra.mxu0 %v3273_v56  ;;  %v2769_v22 = vld [vmem:[#allocation7 + $0x2c4] ss:$8 sps:$4 sm:$0xff]  }
 0x230   :  { %1560 = vmatpush1.bf16.msra.mxu1 %v2725_v38  ;;  %v2767_v38 = vld [vmem:[#allocation7 + $0x2c0] ss:$8 sps:$4 sm:$0xff]  }
 0x231   :  { %1561 = vmatprep.subr.bf16.mxu1 %v2730_v51  ;;  %v2772_v51 = vld [vmem:[#allocation7 + $0x2d4] ss:$8 sps:$4 sm:$0xff]  }
 0x234   :  { %1562 = vmatpush1.bf16.msra.mxu1 %v2728_v54  ;;  %v2770_v54 = vld [vmem:[#allocation7 + $0x2d0] ss:$8 sps:$4 sm:$0xff]  }
 0x235   :  { %1801 = vmatprep.subr.bf16.mxu1 %v2733_v55  ;;  %v2775_v55 = vld [vmem:[#allocation7 + $0x2e4] ss:$8 sps:$4 sm:$0xff]  }
 0x237   :  { %1564 = vmatmul.mubr.bf16.vlgmr.msra.gmra.mrb[0].mxu1 %v3157_v4 }
 0x238   :  { %1573 = vmatprep.mubr.bf16.mxu1 %v3182_v41  ;;  %1802 = vmatpush1.bf16.msra.mxu1 %v2731_v57  ;;  %v2773_v57 = vld [vmem:[#allocation7 + $0x2e0] ss:$8 sps:$4 sm:$0xff]  }
 0x239   :  { %1803 = vmatprep.subr.bf16.mxu1 %v2736_v60  ;;  %v2778_v60 = vld [vmem:[#allocation7 + $0x2f4] ss:$8 sps:$4 sm:$0xff]  }
 0x23c   :  { %1804 = vmatpush1.bf16.msra.mxu1 %v2734_v62  ;;  %v2776_v62 = vld [vmem:[#allocation7 + $0x2f0] ss:$8 sps:$4 sm:$0xff]  }
 0x23d   :  { %1805 = vmatprep.subr.bf16.mxu1 %v2739_v2  ;;  %v1592_v2 = vrot.slane %v3157_v4, 1  ;;  %v1598_v4 = vrot.slane %v3170_v35, 1 }
 0x23f   :  { %1574 = vmatmul.mubr.bf16.gmra.mrb[4].mxu1 %v3170_v35  ;;  %v2821_v35 = vld [vmem:[#allocation8 + $0xe0] ss:$8 sps:$4 sm:$0xff]  }
 0x240   :  { %1806 = vmatpush1.bf16.msra.mxu1 %v2737_v6  ;;  %1833 = vmatprep.mubr.bf16.mxu1 %v3178_v40  ;;  %v2755_v40 = vld [vmem:[#allocation7 + $0x280] ss:$8 sps:$4 sm:$0xff]   ;;  %v1601_v6 = vrot.slane %v3182_v41, 1  ;;  %v1599_v41 = vrot.slane %v3174_v36, 1  ;;  %v2826_v36 = vld [vmem:[#allocation8 + $0xf4] ss:$8 sps:$4 sm:$0xff]  }
 0x241   :  { %1807 = vmatprep.subr.bf16.mxu1 %v2742_v10  ;;  %v1593_v10 = vrot.slane %v3151_v63, 1 }
 0x242   :  { %v1600_v63 = vsel %vm694_vm4, %v1598_v4, %v1599_v41 }
 0x244   :  { %1808 = vmatpush1.bf16.msra.mxu1 %v2740_v3  ;;  %v1602_v3 = vrot.slane %v3166_v32, 1  ;;  %v2823_v32 = vld [vmem:[#allocation8 + $0xe4] ss:$8 sps:$4 sm:$0xff]  }
 0x245   :  { %1809 = vmatprep.subr.bf16.mxu1 %v2745_v12  ;;  %v1594_v12 = vsel %vm694_vm4, %v1592_v2, %v1593_v10  ;;  %2126 = vmatprep.subr.bf16.mxu0 %v2823_v32 }
 0x246   :  { %2127 = vmatpush1.bf16.msra.mxu0 %v2821_v35 }
 0x247   :  { %2128 = vmatprep.subr.bf16.mxu0 %v2826_v36 }
 0x248   :  { %1810 = vmatpush1.bf16.msra.mxu1 %v2743_v5  ;;  %v1603_v5 = vsel %vm694_vm4, %v1601_v6, %v1602_v3  ;;  %v2830_v6 = vld [vmem:[#allocation2 + $0x18] sm:$0xff] }
 0x249   :  { %1811 = vmatprep.subr.bf16.mxu1 %v2748_v14 }
 0x24c   :  { %1812 = vmatpush1.bf16.msra.mxu1 %v2746_v15 }
 0x24d   :  { %1813 = vmatprep.subr.bf16.mxu1 %v2751_v21 }
 0x250   :  { %1814 = vmatpush1.bf16.msra.mxu1 %v2749_v18 }
 0x251   :  { %1815 = vmatprep.subr.bf16.mxu1 %v2754_v23  ;;  %v1926_v23 = vld [vmem:[%s3349_s6] sm:$0x3]  ;;  %s2961_s6 = smov [#allocation10]  }
 0x252   :  { %s2180_s8 = sshll.u32 %s2961_s6, 4  ;;  %s2181_s8 = int_to_ptr.vmem [resolvable:$true] %s2180_s8 }
 0x253   :  { %s2923_s9 = scalar_lea.vmem %s2181_s8, 1024  ;;  %p2928_p5 = scmp.lt.s32.totalorder %s2181_s8, %s2181_s8 }
 0x254   :  { %1816 = vmatpush1.bf16.msra.mxu1 %v2752_v24  ;;  %v1931_v24 = vrot.slane %v1926_v23, %v3140_v25  ;;  %p2924_p4 = scmp.ne.s32.totalorder %s2181_s8, %s2923_s9  ;;  %p2929_p6 = scmp.lt.s32.totalorder %s2923_s9, %s2923_s9 }
 0x255   :  { %1817 = vmatprep.subr.bf16.mxu1 %v2757_v31  ;;  %v1935_v31 = vrot.slane %v1926_v23, %v3145_v28 }
 0x256   :  { %p2930_p7 = por %p2929_p6, %p2928_p5 }
 0x258   :  { %1818 = vmatpush1.bf16.msra.mxu1 %v2755_v40  ;;  %p2931_p8 = pnand %p2930_p7, %p2924_p4 }
 0x259   :  { %1819 = vmatprep.subr.bf16.mxu1 %v2760_v33 }
 0x25c   :  { %1820 = vmatpush1.bf16.msra.mxu1 %v2758_v39 }
 0x25d   :  { %1821 = vmatprep.subr.bf16.mxu1 %v2763_v42 }
 0x260   :  { %1822 = vmatpush1.bf16.msra.mxu1 %v2761_v26 }
 0x261   :  { %1823 = vmatprep.subr.bf16.mxu1 %v2766_v45  ;;  %v2827_v45 = vld [vmem:[#allocation2] sm:$0xff] }
 0x264   :  { %1824 = vmatpush1.bf16.msra.mxu1 %v2764_v48 }
 0x265   :  { %1825 = vmatprep.subr.bf16.mxu1 %v2769_v22 }
 0x268   :  { %1826 = vmatpush1.bf16.msra.mxu1 %v2767_v38 }
 0x269   :  { %1827 = vmatprep.subr.bf16.mxu1 %v2772_v51  ;;  %v2828_v51 = vld [vmem:[#allocation2 + $0x8] sm:$0xff] }
 0x26c   :  { %1828 = vmatpush1.bf16.msra.mxu1 %v2770_v54 }
 0x26d   :  { %1829 = vmatprep.subr.bf16.mxu1 %v2775_v55 }
 0x270   :  { %1830 = vmatpush1.bf16.msra.mxu1 %v2773_v57 }
 0x271   :  { %1831 = vmatprep.subr.bf16.mxu1 %v2778_v60  ;;  %v2829_v60 = vld [vmem:[#allocation2 + $0x10] sm:$0xff] }
 0x274   :  { %1832 = vmatpush1.bf16.msra.mxu1 %v2776_v62 }
 0x275   :  { %2418 = vmatprep.subr.bf16.mxu1 %v3195_v29  ;;  %v1862_v29 = vld [vmem:[%s3347_s4] sm:$0x3] }
 0x277   :  { %1834 = vmatmul.mubr.bf16.vlgmr.msra.gmra.mrb[0].mxu1 %v1594_v12 }
 0x278   :  { %1843 = vmatprep.mubr.bf16.mxu1 %v1603_v5  ;;  %2434 = vmatpush1.bf16.msra.mxu1 %v3193_v59  ;;  %v2824_v59 = vld [vmem:[#allocation8 + $0xf0] ss:$8 sps:$4 sm:$0xff]  }
 0x279   :  { %2419 = vmatprep.subr.bf16.mxu1 %v3197_v61  ;;  %2129 = vmatpush1.bf16.msra.mxu0 %v2824_v59  ;;  %v1867_v61 = vrot.slane %v1862_v29, %v3140_v25 }
 0x27c   :  { %2435 = vmatpush1.bf16.msra.mxu1 %v3201_v0  ;;  %v1871_v0 = vrot.slane %v1862_v29, %v3145_v28 }
 0x27d   :  { %2420 = vmatprep.subr.bf16.mxu1 %v3204_v1 }
 0x27f   :  { %1844 = vmatmul.mubr.bf16.gmra.mrb[4].mxu1 %v1600_v63  ;;  %v2831_v63 = vld [vmem:[#allocation2 + $0x20] sm:$0xff] }
 0x280   :  { %2436 = vmatpush1.bf16.msra.mxu1 %v3207_v8 }
 0x281   :  { %2421 = vmatprep.subr.bf16.mxu1 %v3210_v9 }
 0x284   :  { %2437 = vmatpush1.bf16.msra.mxu1 %v3213_v11 }
 0x285   :  { %2422 = vmatprep.subr.bf16.mxu1 %v3216_v58 }
 0x288   :  { %2438 = vmatpush1.bf16.msra.mxu1 %v3219_v7 }
 0x289   :  { %2423 = vmatprep.subr.bf16.mxu1 %v3222_v13 }
 0x28c   :  { %2439 = vmatpush1.bf16.msra.mxu1 %v3225_v16 }
 0x28d   :  { %2424 = vmatprep.subr.bf16.mxu1 %v3228_v17 }
 0x290   :  { %2440 = vmatpush1.bf16.msra.mxu1 %v3231_v19 }
 0x291   :  { %2425 = vmatprep.subr.bf16.mxu1 %v3234_v20 }
 0x294   :  { %2441 = vmatpush1.bf16.msra.mxu1 %v3237_v27 }
 0x295   :  { %2426 = vmatprep.subr.bf16.mxu1 %v3240_v30 }
 0x298   :  { %2442 = vmatpush1.bf16.msra.mxu1 %v3243_v34 }
 0x299   :  { %2427 = vmatprep.subr.bf16.mxu1 %v3246_v37 }
 0x29c   :  { %2443 = vmatpush1.bf16.msra.mxu1 %v3249_v43 }
 0x29d   :  { %2428 = vmatprep.subr.bf16.mxu1 %v3252_v44 }
 0x2a0   :  { %2444 = vmatpush1.bf16.msra.mxu1 %v3255_v46 }
 0x2a1   :  { %2429 = vmatprep.subr.bf16.mxu1 %v3258_v47 }
 0x2a4   :  { %2445 = vmatpush1.bf16.msra.mxu1 %v3261_v49 }
 0x2a5   :  { %2430 = vmatprep.subr.bf16.mxu1 %v3264_v50 }
 0x2a8   :  { %2446 = vmatpush1.bf16.msra.mxu1 %v3267_v52 }
 0x2a9   :  { %2431 = vmatprep.subr.bf16.mxu1 %v3270_v53 }
 0x2ac   :  { %2447 = vmatpush1.bf16.msra.mxu1 %v3273_v56 }
 0x2ad   :  { %2432 = vmatprep.subr.bf16.mxu1 %v2823_v32 }
 0x2b0   :  { %2448 = vmatpush1.bf16.msra.mxu1 %v2821_v35 }
 0x2b1   :  { %2433 = vmatprep.subr.bf16.mxu1 %v2826_v36 }
 0x2b4   :  { %2449 = vmatpush1.bf16.msra.mxu1 %v2824_v59  ;;  %v2832_v59 = vld [vmem:[#allocation2 + $0x28] sm:$0xff] }
 0x34a   :  { %v1835_v1 = vpop.f32.mrb[0].mxu1 }
 0x34b   :  { %v1874_v8 = vadd.f32 %v1867_v61, %v1835_v1  ;;  %v1837_v9 = vpop.f32.mrb[1].mxu1  ;;  %v2833_v1 = vld [vmem:[#allocation2 + $0x30] sm:$0xff] }
 0x34c   :  { %v1875_v11 = vadd.f32 %v1871_v0, %v1837_v9  ;;  %v1839_v58 = vpop.f32.mrb[2].mxu1 }
 0x34d   :  { %v1876_v7 = vadd.f32 %v1867_v61, %v1839_v58  ;;  %v1841_v13 = vpop.f32.mrb[3].mxu1  ;;  %v1882_v17 = vmax.f32 %v1874_v8, 0.0 }
 0x34e   :  { %v1877_v16 = vadd.f32 %v1871_v0, %v1841_v13  ;;  %v1883_v20 = vmax.f32 %v1875_v11, 0.0  ;;  %v2834_v11 = vld [vmem:[#allocation2 + $0x38] sm:$0xff] }
 0x34f   :  { %v1884_v19 = vmax.f32 %v1876_v7, 0.0 }
 0x350   :  { %v1885_v27 = vmax.f32 %v1877_v16, 0.0 }
 0x351   :  { %v1890_v30 = vpack.c.bf16 %v1884_v19, %v1882_v17 }
 0x352   :  { %v1891_v34 = vpack.c.bf16 %v1885_v27, %v1883_v20  ;;  %v1845_v37 = vpop.f32.mrb[4].mxu1 }
 0x353   :  { %v1878_v43 = vadd.f32 %v1867_v61, %v1845_v37  ;;  %v1847_v44 = vpop.f32.mrb[5].mxu1 }
 0x354   :  { %v1879_v46 = vadd.f32 %v1871_v0, %v1847_v44  ;;  %v1849_v47 = vpop.f32.mrb[6].mxu1  ;;  %2130 = vmatprep.mubr.bf16.mxu0 %v1891_v34 }
 0x355   :  { %v1880_v49 = vadd.f32 %v1867_v61, %v1849_v47  ;;  %v1851_v50 = vpop.f32.mrb[7].mxu1  ;;  %2131 = vmatmul.mubr.bf16.vlgmr.msra.gmra.mrb[8].mxu0 %v1890_v30  ;;  %v1886_v53 = vmax.f32 %v1878_v43, 0.0 }
 0x356   :  { %v1881_v52 = vadd.f32 %v1871_v0, %v1851_v50  ;;  %v1887_v14 = vmax.f32 %v1879_v46, 0.0 }
 0x357   :  { %v1888_v56 = vmax.f32 %v1880_v49, 0.0 }
 0x358   :  { %v1889_v15 = vmax.f32 %v1881_v52, 0.0 }
 0x359   :  { %v1892_v21 = vpack.c.bf16 %v1888_v56, %v1886_v53 }
 0x35a   :  { %v1893_v18 = vpack.c.bf16 %v1889_v15, %v1887_v14 }
 0x35c   :  { %2140 = vmatprep.mubr.bf16.mxu1 %v1893_v18 }
 0x35d   :  { %2141 = vmatmul.mubr.bf16.vlgmr.msra.gmra.mrb[8].mxu1 %v1892_v21 }
 0x428   :  { %v2132_v40 = vpop.f32.mrb[8].mxu0 }
 0x429   :  { %v2133_v33 = vadd.f32 %v2132_v40, %v1931_v24  ;;  %v2134_v39 = vpop.f32.mrb[9].mxu0 }
 0x42a   :  { %v2135_v42 = vadd.f32 %v2134_v39, %v1935_v31  ;;  %v2136_v26 = vpop.f32.mrb[10].mxu0 }
 0x42b   :  { %v2151_v48 = vadd.f32 %v2827_v45, %v2133_v33  ;;  %v2137_v22 = vadd.f32 %v2136_v26, %v1931_v24  ;;  %v2138_v38 = vpop.f32.mrb[11].mxu0 }
 0x42c   :  { %v2152_v54 = vadd.f32 %v2828_v51, %v2135_v42  ;;  %v2139_v55 = vadd.f32 %v2138_v38, %v1935_v31 }
 0x42d   :  { %v2159_v57 = vmax.f32 %v2151_v48, 0.0  ;;  %v2153_v62 = vadd.f32 %v2829_v60, %v2137_v22 }
 0x42e   :  { %v2160_v2 = vmax.f32 %v2152_v54, 0.0  ;;  %v2154_v25 = vadd.f32 %v2830_v6, %v2139_v55 }
 0x42f   :  { %2167 = vst [vmem:[#allocation10] sm:$0xff] %v2159_v57  ;;  %v2161_v28 = vmax.f32 %v2153_v62, 0.0 }
 0x430   :  { %2168 = vst [vmem:[#allocation10 + $0x8] sm:$0xff] %v2160_v2  ;;  %v2162_v10 = vmax.f32 %v2154_v25, 0.0  ;;  %v2142_v3 = vpop.f32.mrb[8].mxu1 }
 0x431   :  { %2169 = vst [vmem:[#allocation10 + $0x10] sm:$0xff] %v2161_v28  ;;  %v2143_v12 = vadd.f32 %v2142_v3, %v1931_v24  ;;  %v2144_v5 = vpop.f32.mrb[9].mxu1 }
 0x432   :  { %2170 = vst [vmem:[#allocation10 + $0x18] sm:$0xff] %v2162_v10  ;;  %v2145_v4 = vadd.f32 %v2144_v5, %v1935_v31  ;;  %v2146_v41 = vpop.f32.mrb[10].mxu1 }
 0x433   :  { %v2155_v32 = vadd.f32 %v2831_v63, %v2143_v12  ;;  %v2147_v35 = vadd.f32 %v2146_v41, %v1931_v24  ;;  %v2148_v36 = vpop.f32.mrb[11].mxu1 }
 0x434   :  { %v2156_v29 = vadd.f32 %v2832_v59, %v2145_v4  ;;  %v2149_v61 = vadd.f32 %v2148_v36, %v1935_v31 }
 0x435   :  { %v2163_v0 = vmax.f32 %v2155_v32, 0.0  ;;  %v2157_v8 = vadd.f32 %v2833_v1, %v2147_v35 }
 0x436   :  { %v2164_v9 = vmax.f32 %v2156_v29, 0.0  ;;  %v2158_v58 = vadd.f32 %v2834_v11, %v2149_v61 }
 0x437   :  { %2171 = vst [vmem:[#allocation10 + $0x20] sm:$0xff] %v2163_v0  ;;  %v2165_v7 = vmax.f32 %v2157_v8, 0.0 }
 0x438   :  { %2172 = vst [vmem:[#allocation10 + $0x28] sm:$0xff] %v2164_v9  ;;  %v2166_v13 = vmax.f32 %v2158_v58, 0.0 }
 0x439   :  { %2173 = vst [vmem:[#allocation10 + $0x30] sm:$0xff] %v2165_v7 }
 0x43a   :  { %2174 = vst [vmem:[#allocation10 + $0x38] sm:$0xff] %v2166_v13 }
 0x43b   :  { %2934 = shalt.err (!%p2931_p8)
}
 0x43c   :  { %s2935_s14 = scalar_lea.hbm %s3350_s7, 1024 }
 0x43d   :  { %p2936_p9 = scmp.ne.s32.totalorder %s3350_s7, %s2935_s14  ;;  %p2939_p10 = scmp.lt.u32.totalorder %s2935_s14, %s3350_s7 }
 0x43f   :  { %p2941_p11 = pnand %p2939_p10, %p2936_p9 }
 0x441   :  { %2944 = shalt.err (!%p2941_p11)
}
 0x442   :  { %2186 = dma.vmem_to_hbm [thread:$0]  %s2181_s8, 1024, %s3350_s7, [#allocation4], %s2957_s1, %s2957_s1, %s2958_s25  }
 0x443   :  { %2951 = dma.done.wait [#allocation4], 1024  }
 0x444   :  { %2952 = vsyncadd [#allocation4], 4294966272 }
 0x445   :  { %2190 = vsyncpa [#allocation3], 1 }
 0x446   :  { %2191 = vsyncpa [#allocation6], 1 }
 0x447   :  { %2192 = vsyncpa [#allocation9], 1 }
 0x448   :  { %2193 = vsyncpa [#allocation4], 1 }

</bundles_post_ra>
